<compile_context>
chip_gen: v7x
topology: tpu7x:2x2x1
jax: 0.10.0
libtpu: 0.0.40
codegen_flags: <defaults>
</compile_context>

<pallas_src>
import functools
import math

import numpy as np
import jax
import jax.numpy as jnp
from jax.experimental import pallas as pl
from jax.experimental.pallas import tpu as pltpu


# ----------------------------------------------------------------------------
# Fused per-video training-step kernel
# ----------------------------------------------------------------------------
def _fused_vae_step_kernel(
    # scalars (SMEM)
    tfr_ref,
    # streamed per-(row-tile, timestep) tensors (VMEM, bf16)
    img0_ref, target_ref, label_ref, eps_ref,
    # weights / biases (VMEM, f32, fetched once because their index is constant)
    w_fe_ref, b_fe_ref, w_le_ref, b_le_ref,
    w_gf_ref, w_gl_ref, b_g_ref,
    w_df_ref, w_dl_ref, w_dz_ref, b_d_ref,
    w_gen_ref, b_gen_ref,
    # outputs (VMEM, f32, resident across the time axis -> accumulators)
    sse_ref, kl_ref, last_sse_ref,
    # VMEM scratch (persists across the time axis of the current row tile)
    out_carry, prev_carry,
    *, n_dim, n_valid_rows, n_padded_rows, tile_rows,
):
    rt = pl.program_id(0)          # row-tile index   ("parallel")
    ti = pl.program_id(1)          # timestep index   ("arbitrary", frame i = ti+1)
    n_t = pl.num_programs(1)
    tfr = tfr_ref[0, 0]

    @pl.when(ti == 0)
    def _init():
        first = img0_ref[...].astype(jnp.float32)
        out_carry[...] = first            # out       = img[0]
        prev_carry[...] = first           # img[i-1]  for i == 1
        sse_ref[...] = jnp.zeros_like(sse_ref)
        kl_ref[...] = jnp.zeros_like(kl_ref)
        last_sse_ref[...] = jnp.zeros_like(last_sse_ref)

    # teacher forcing blend (mode == 1):  out = img[i-1]*tfr + out*(1 - tfr)
    blended = prev_carry[...] * tfr + out_carry[...] * (1.0 - tfr)

    # Cin == 3 encoders as three broadcast-FMAs on the VPU (K = 3 would leave
    # the MXU almost entirely idle and pay push/pop latency).
    def enc3(x3, w_ref, b_ref):
        w = w_ref[...]
        y = w[:, 0:1] * x3[0:1, :]
        y = y + w[:, 1:2] * x3[1:2, :]
        y = y + w[:, 2:3] * x3[2:3, :]
        return y + b_ref[...]

    frame_feat = enc3(blended, w_fe_ref, b_fe_ref)                          # (F, TR)
    label_feat = enc3(label_ref[...].astype(jnp.float32), w_le_ref, b_le_ref)  # (L, TR)

    # Gaussian predictor -- split weights, no concatenate of (F+L, TR).
    g = (jnp.dot(w_gf_ref[...], frame_feat, preferred_element_type=jnp.float32)
         + jnp.dot(w_gl_ref[...], label_feat, preferred_element_type=jnp.float32)
         + b_g_ref[...])                                                    # (2N, TR)
    mu = g[:n_dim, :]
    logvar = g[n_dim:, :]

    # reparameterization: z = mu + exp(0.5*logvar) * eps
    z = mu + jnp.exp(0.5 * logvar) * eps_ref[...].astype(jnp.float32)       # (N, TR)

    # Decoder fusion + generator -- split weights, no concatenate.
    parm = (jnp.dot(w_df_ref[...], frame_feat, preferred_element_type=jnp.float32)
            + jnp.dot(w_dl_ref[...], label_feat, preferred_element_type=jnp.float32)
            + jnp.dot(w_dz_ref[...], z, preferred_element_type=jnp.float32)
            + b_d_ref[...])                                                 # (D, TR)
    out_new = (jnp.dot(w_gen_ref[...], parm, preferred_element_type=jnp.float32)
               + b_gen_ref[...])                                            # (3, TR)

    target = target_ref[...].astype(jnp.float32)

    # Fused loss reductions (lane-wise partial sums, finished in the wrapper).
    d = out_new - target
    sse_lanes = jnp.sum(d * d, axis=0, keepdims=True)                       # (1, TR)
    kl_lanes = jnp.sum(1.0 + logvar - mu * mu - jnp.exp(logvar),
                       axis=0, keepdims=True)                               # (1, TR)

    if n_padded_rows != n_valid_rows:   # static: mask the zero-padded rows
        lane = jax.lax.broadcasted_iota(jnp.int32, (1, tile_rows), 1)
        valid = (rt * tile_rows + lane) < n_valid_rows
        sse_lanes = jnp.where(valid, sse_lanes, 0.0)
        kl_lanes = jnp.where(valid, kl_lanes, 0.0)

    sse_ref[...] += sse_lanes
    kl_ref[...] += kl_lanes

    @pl.when(ti == n_t - 1)
    def _last():
        last_sse_ref[...] = sse_lanes

    # Carry state to the next timestep -- stays in VMEM, no HBM round trip.
    out_carry[...] = out_new
    prev_carry[...] = target


# ----------------------------------------------------------------------------
# Layout helpers, KL annealing, PSNR, params
# ----------------------------------------------------------------------------
def _round_up(x, m):
    return ((x + m - 1) // m) * m


def video_to_rows(x):
    """[B, T, C, H, W] -> (T, C, B*H*W): channels on sublanes, pixels on lanes."""
    b, t, c, h, w = x.shape
    return jnp.transpose(x, (1, 2, 0, 3, 4)).reshape(t, c, b * h * w)


def _pad_rows(x, r_pad):
    r = x.shape[-1]
    if r == r_pad:
        return x
    return jnp.pad(x, ((0, 0), (0, 0), (0, r_pad - r)))


def generate_psnr(mse, data_range=1.0):
    """Generate_PSNR: 20*log10(range) - 10*log10(mse)."""
    return 20.0 * math.log10(data_range) - 10.0 * jnp.log10(mse)


def frange_cycle_linear(n_iter, start=0.0, stop=1.0, n_cycle=1, ratio=1.0):
    beta_values = np.ones(n_iter) * stop
    period = n_iter / n_cycle
    step = (stop - start) / (period * ratio)
    for c in range(n_cycle):
        v, i = start, 0
        while v <= stop and int(i + c * period) < n_iter:
            beta_values[int(i + c * period)] = v
            v += step
            i += 1
    return beta_values


def init_linear(key, cin, cout):
    kw, kb = jax.random.split(key)
    w = jax.random.normal(kw, (cout, cin), jnp.float32) * (1.0 / np.sqrt(cin))
    b = jax.random.normal(kb, (cout, 1), jnp.float32) * 0.01
    return w, b


def init_params(key, F_dim, L_dim, N_dim, D_out_dim):
    ks = jax.random.split(key, 5)
    return {
        # channel interfaces exactly as in VAE_Model.__init__
        "frame_enc": init_linear(ks[0], 3, F_dim),                         # RGB_Encoder(3, F)
        "label_enc": init_linear(ks[1], 3, L_dim),                         # Label_Encoder(3, L)
        "gauss":     init_linear(ks[2], F_dim + L_dim, 2 * N_dim),         # Gaussian_Predictor -> (mu, logvar)
        "fusion":    init_linear(ks[3], F_dim + L_dim + N_dim, D_out_dim), # Decoder_Fusion
        "generator": init_linear(ks[4], D_out_dim, 3),                     # Generator(D_out, 3)
    }


# ----------------------------------------------------------------------------
# One training step forward pass (VAE_Model.training_one_step, mode == 1 path)
# ----------------------------------------------------------------------------
@functools.partial(jax.jit, static_argnames=("batch_size", "n_dim", "tile_rows"))
def vae_training_one_step(params, img, label, eps_seq, tfr, beta, *,
                          batch_size, n_dim, tile_rows=512):
    """img/label: [B, T, 3, H, W] f32 in [0,1]; eps_seq: [T-1, N_dim, B*H*W].
    Returns (loss, reconstruction_loss, kl_loss, psnr_of_last_frame)."""
    B, T, C, H, W = img.shape
    R = B * H * W
    tile = min(tile_rows, _round_up(R, 128))
    r_pad = _round_up(R, tile)
    n_tiles = r_pad // tile

    # One layout pass per tensor, hoisted out of the time loop; bf16 storage.
    img_rows = _pad_rows(video_to_rows(img).astype(jnp.bfloat16), r_pad)      # (T, 3, Rp)
    label_rows = _pad_rows(video_to_rows(label).astype(jnp.bfloat16), r_pad)  # (T, 3, Rp)
    eps_rows = _pad_rows(eps_seq.astype(jnp.bfloat16), r_pad)                 # (T-1, N, Rp)

    w_fe, b_fe = params["frame_enc"]
    w_le, b_le = params["label_enc"]
    w_g, b_g = params["gauss"]
    w_d, b_d = params["fusion"]
    w_gen, b_gen = params["generator"]
    F = w_fe.shape[0]
    L = w_le.shape[0]
    # pre-split concat weights so the kernel never materializes gp_in / fuse_in
    w_gf, w_gl = w_g[:, :F], w_g[:, F:]
    w_df, w_dl, w_dz = w_d[:, :F], w_d[:, F:F + L], w_d[:, F + L:]

    tfr_arr = jnp.asarray(tfr, jnp.float32).reshape(1, 1)

    kernel = functools.partial(
        _fused_vae_step_kernel,
        n_dim=n_dim, n_valid_rows=R, n_padded_rows=r_pad, tile_rows=tile)

    def _full(a):
        shp = a.shape
        return pl.BlockSpec(shp, lambda rt, ti: (0,) * len(shp))

    def _frame_spec(off):
        return pl.BlockSpec((None, C, tile), lambda rt, ti, _o=off: (ti + _o, 0, rt))

    out_lane_spec = pl.BlockSpec((1, tile), lambda rt, ti: (0, rt))

    sse, kl_raw, last_sse = pl.pallas_call(
        kernel,
        out_shape=(
            jax.ShapeDtypeStruct((1, r_pad), jnp.float32),   # sum of squared errors
            jax.ShapeDtypeStruct((1, r_pad), jnp.float32),   # raw KL terms
            jax.ShapeDtypeStruct((1, r_pad), jnp.float32),   # last-frame SSE
        ),
        grid=(n_tiles, T - 1),
        in_specs=[
            pl.BlockSpec(memory_space=pltpu.MemorySpace.SMEM),                  # tfr
            pl.BlockSpec((None, C, tile), lambda rt, ti: (0, 0, rt)),           # img[0]
            _frame_spec(1),                                                     # img[i]   (target / next prev)
            _frame_spec(1),                                                     # label[i]
            pl.BlockSpec((None, n_dim, tile), lambda rt, ti: (ti, 0, rt)),      # eps[i-1]
            _full(w_fe), _full(b_fe), _full(w_le), _full(b_le),
            _full(w_gf), _full(w_gl), _full(b_g),
            _full(w_df), _full(w_dl), _full(w_dz), _full(b_d),
            _full(w_gen), _full(b_gen),
        ],
        out_specs=(out_lane_spec, out_lane_spec, out_lane_spec),
        scratch_shapes=[
            pltpu.VMEM((C, tile), jnp.float32),   # generated-frame carry ("out")
            pltpu.VMEM((C, tile), jnp.float32),   # previous ground-truth frame carry
        ],
        compiler_params=pltpu.CompilerParams(
            dimension_semantics=("parallel", "arbitrary"),
            vmem_limit_bytes=32 * 1024 * 1024,
        ),
    )(tfr_arr, img_rows, img_rows, label_rows, eps_rows,
      w_fe, b_fe, w_le, b_le, w_gf, w_gl, b_g,
      w_df, w_dl, w_dz, b_d, w_gen, b_gen)

    denom = jnp.float32(R * C)                                # nn.MSELoss mean denominator
    recon_loss = jnp.sum(sse) / denom                         # sum_i mean-MSE of frame i
    kl_loss = -0.5 * jnp.sum(kl_raw) / jnp.float32(batch_size)
    mse_last = jnp.sum(last_sse) / denom
    psnr_last = generate_psnr(mse_last)
    loss = recon_loss + jnp.asarray(beta, jnp.float32) * kl_loss
    return loss, recon_loss, kl_loss, psnr_last


# ----------------------------------------------------------------------------
# Pure-JAX reference (same math, same bf16-rounded inputs) for validation
# ----------------------------------------------------------------------------
def reference_training_one_step(params, img, label, eps_seq, tfr, beta,
                                batch_size, n_dim):
    img_rows = video_to_rows(img).astype(jnp.bfloat16).astype(jnp.float32)
    label_rows = video_to_rows(label).astype(jnp.bfloat16).astype(jnp.float32)
    eps_rows = eps_seq.astype(jnp.bfloat16).astype(jnp.float32)
    T = img_rows.shape[0]

    w_fe, b_fe = params["frame_enc"]
    w_le, b_le = params["label_enc"]
    w_g, b_g = params["gauss"]
    w_d, b_d = params["fusion"]
    w_gen, b_gen = params["generator"]

    out = img_rows[0]
    recon = jnp.float32(0.0)
    kl = jnp.float32(0.0)
    mse_last = jnp.float32(1.0)
    for i in range(1, T):
        out = img_rows[i - 1] * tfr + out * (1.0 - tfr)
        ff = w_fe @ out + b_fe
        lf = w_le @ label_rows[i] + b_le
        g = w_g @ jnp.concatenate([ff, lf], axis=0) + b_g
        mu, logvar = g[:n_dim], g[n_dim:]
        z = mu + jnp.exp(0.5 * logvar) * eps_rows[i - 1]
        parm = w_d @ jnp.concatenate([ff, lf, z], axis=0) + b_d
        out = w_gen @ parm + b_gen
        mse = jnp.mean((out - img_rows[i]) ** 2)
        recon = recon + mse
        kl = kl + (-0.5) * jnp.sum(1.0 + logvar - mu * mu - jnp.exp(logvar)) / batch_size
        mse_last = mse
    loss = recon + beta * kl
    return loss, recon, kl, generate_psnr(mse_last)


# ----------------------------------------------------------------------------
if __name__ == "__main__":
    # Small shapes consistent with the module.  R = B*H*W = 768 is NOT a
    # multiple of the 512-row tile, so the padding/masking path is exercised.
    B, T, H, W = 3, 6, 16, 16
    F_dim, L_dim, N_dim, D_out_dim = 32, 16, 8, 32
    tfr = 0.7                                   # args.tfr (teacher forcing ratio)
    num_epoch, kl_cycle, kl_ratio = 10, 2, 1.0

    # KLAnnealing (Cyclical); epoch 1 so beta is non-zero and the KL term matters.
    beta_schedule = frange_cycle_linear(num_epoch, 0.0, 1.0, kl_cycle, kl_ratio)
    beta = float(beta_schedule[1])

    key = jax.random.PRNGKey(0)
    k_param, k_img, k_label, k_eps = jax.random.split(key, 4)

    params = init_params(k_param, F_dim, L_dim, N_dim, D_out_dim)
    img = jax.random.uniform(k_img, (B, T, 3, H, W), jnp.float32)
    label = jax.random.uniform(k_label, (B, T, 3, H, W), jnp.float32)
    eps_seq = jax.random.normal(k_eps, (T - 1, N_dim, B * H * W), jnp.float32)

    loss, recon, kl, psnr = vae_training_one_step(
        params, img, label, eps_seq, jnp.float32(tfr), jnp.float32(beta),
        batch_size=B, n_dim=N_dim)
    jax.block_until_ready((loss, recon, kl, psnr))

    # correctness check against the pure-JAX reference on identical inputs
    ref_loss, ref_recon, ref_kl, ref_psnr = reference_training_one_step(
        params, img, label, eps_seq, jnp.float32(tfr), jnp.float32(beta),
        batch_size=B, n_dim=N_dim)
    np.testing.assert_allclose(
        np.array([float(loss), float(recon), float(kl)], dtype=np.float64),
        np.array([float(ref_loss), float(ref_recon), float(ref_kl)], dtype=np.float64),
        rtol=2e-2, atol=1e-3)
    np.testing.assert_allclose(float(psnr), float(ref_psnr), rtol=0, atol=0.1)

    print("KERNEL_OK")
</pallas_src>

<mosaic_0001>
module attributes {stable_mosaic.version = 11 : i64} {
  func.func @_fused_vae_step_kernel(%arg0: i32, %arg1: i32, %arg2: memref<1x1xf32, #tpu.memory_space<smem>>, %arg3: memref<1x3x512xbf16, #tpu.memory_space<vmem>>, %arg4: memref<1x3x512xbf16, #tpu.memory_space<vmem>>, %arg5: memref<1x3x512xbf16, #tpu.memory_space<vmem>>, %arg6: memref<1x8x512xbf16, #tpu.memory_space<vmem>>, %arg7: memref<32x3xf32, #tpu.memory_space<vmem>>, %arg8: memref<32x1xf32, #tpu.memory_space<vmem>>, %arg9: memref<16x3xf32, #tpu.memory_space<vmem>>, %arg10: memref<16x1xf32, #tpu.memory_space<vmem>>, %arg11: memref<16x32xf32, #tpu.memory_space<vmem>>, %arg12: memref<16x16xf32, #tpu.memory_space<vmem>>, %arg13: memref<16x1xf32, #tpu.memory_space<vmem>>, %arg14: memref<32x32xf32, #tpu.memory_space<vmem>>, %arg15: memref<32x16xf32, #tpu.memory_space<vmem>>, %arg16: memref<32x8xf32, #tpu.memory_space<vmem>>, %arg17: memref<32x1xf32, #tpu.memory_space<vmem>>, %arg18: memref<3x32xf32, #tpu.memory_space<vmem>>, %arg19: memref<3x1xf32, #tpu.memory_space<vmem>>, %arg20: memref<1x512xf32, #tpu.memory_space<vmem>>, %arg21: memref<1x512xf32, #tpu.memory_space<vmem>>, %arg22: memref<1x512xf32, #tpu.memory_space<vmem>>, %arg23: memref<3x512xf32, #tpu.memory_space<vmem>>, %arg24: memref<3x512xf32, #tpu.memory_space<vmem>>) attributes {dimension_semantics = [#tpu.dimension_semantics<parallel>, #tpu.dimension_semantics<arbitrary>], iteration_bounds = array<i64: 2, 5>, scalar_prefetch = 0 : i64, scratch_operands = 2 : i64, tpu.core_type = #tpu.core_type<tc>, window_params = [{transform_indices = @transform_0, window_bounds = array<i64: 1, 1>}, {transform_indices = @transform_1, window_bounds = array<i64: 1, 3, 512>}, {transform_indices = @transform_2, window_bounds = array<i64: 1, 3, 512>}, {transform_indices = @transform_3, window_bounds = array<i64: 1, 3, 512>}, {transform_indices = @transform_4, window_bounds = array<i64: 1, 8, 512>}, {pipeline_mode = #tpu.pipeline_mode<synchronous>, transform_indices = @transform_5, window_bounds = array<i64: 32, 3>}, {pipeline_mode = #tpu.pipeline_mode<synchronous>, transform_indices = @transform_6, window_bounds = array<i64: 32, 1>}, {pipeline_mode = #tpu.pipeline_mode<synchronous>, transform_indices = @transform_7, window_bounds = array<i64: 16, 3>}, {pipeline_mode = #tpu.pipeline_mode<synchronous>, transform_indices = @transform_8, window_bounds = array<i64: 16, 1>}, {pipeline_mode = #tpu.pipeline_mode<synchronous>, transform_indices = @transform_9, window_bounds = array<i64: 16, 32>}, {pipeline_mode = #tpu.pipeline_mode<synchronous>, transform_indices = @transform_10, window_bounds = array<i64: 16, 16>}, {pipeline_mode = #tpu.pipeline_mode<synchronous>, transform_indices = @transform_11, window_bounds = array<i64: 16, 1>}, {pipeline_mode = #tpu.pipeline_mode<synchronous>, transform_indices = @transform_12, window_bounds = array<i64: 32, 32>}, {pipeline_mode = #tpu.pipeline_mode<synchronous>, transform_indices = @transform_13, window_bounds = array<i64: 32, 16>}, {pipeline_mode = #tpu.pipeline_mode<synchronous>, transform_indices = @transform_14, window_bounds = array<i64: 32, 8>}, {pipeline_mode = #tpu.pipeline_mode<synchronous>, transform_indices = @transform_15, window_bounds = array<i64: 32, 1>}, {pipeline_mode = #tpu.pipeline_mode<synchronous>, transform_indices = @transform_16, window_bounds = array<i64: 3, 32>}, {pipeline_mode = #tpu.pipeline_mode<synchronous>, transform_indices = @transform_17, window_bounds = array<i64: 3, 1>}, {transform_indices = @transform_18, window_bounds = array<i64: 1, 512>}, {transform_indices = @transform_19, window_bounds = array<i64: 1, 512>}, {transform_indices = @transform_20, window_bounds = array<i64: 1, 512>}]} {
    %c0 = arith.constant 0 : index
    %c0_0 = arith.constant 0 : index
    %0 = memref.load %arg2[%c0, %c0_0] : memref<1x1xf32, #tpu.memory_space<smem>>
    %c0_i32 = arith.constant 0 : i32
    %1 = arith.cmpi eq, %arg1, %c0_i32 : i32
    %2 = arith.extui %1 : i1 to i32
    %c0_i32_1 = arith.constant 0 : i32
    %3 = arith.cmpi ne, %2, %c0_i32_1 : i32
    scf.if %3 {
      %c0_66 = arith.constant 0 : index
      %c0_67 = arith.constant 0 : index
      %c0_68 = arith.constant 0 : index
      %127 = vector.load %arg3[%c0_66, %c0_67, %c0_68] : memref<1x3x512xbf16, #tpu.memory_space<vmem>>, vector<1x3x512xbf16>
      %128 = vector.shape_cast %127 : vector<1x3x512xbf16> to vector<3x512xbf16>
      %129 = arith.extf %128 : vector<3x512xbf16> to vector<3x512xf32>
      %c0_69 = arith.constant 0 : index
      %c0_70 = arith.constant 0 : index
      %130 = vector.load %arg23[%c0_69, %c0_70] : memref<3x512xf32, #tpu.memory_space<vmem>>, vector<3x512xf32>
      tpu.vector_store %arg23[%c0_69, %c0_70], %129 {strides = array<i32>} : memref<3x512xf32, #tpu.memory_space<vmem>>, vector<3x512xf32>,
      %c0_71 = arith.constant 0 : index
      %c0_72 = arith.constant 0 : index
      %131 = vector.load %arg24[%c0_71, %c0_72] : memref<3x512xf32, #tpu.memory_space<vmem>>, vector<3x512xf32>
      tpu.vector_store %arg24[%c0_71, %c0_72], %129 {strides = array<i32>} : memref<3x512xf32, #tpu.memory_space<vmem>>, vector<3x512xf32>,
      %cst_73 = arith.constant 0.000000e+00 : f32
      %132 = vector.broadcast %cst_73 : f32 to vector<1x512xf32>
      %c0_74 = arith.constant 0 : index
      %c0_75 = arith.constant 0 : index
      %133 = vector.load %arg20[%c0_74, %c0_75] : memref<1x512xf32, #tpu.memory_space<vmem>>, vector<1x512xf32>
      tpu.vector_store %arg20[%c0_74, %c0_75], %132 {strides = array<i32>} : memref<1x512xf32, #tpu.memory_space<vmem>>, vector<1x512xf32>,
      %cst_76 = arith.constant 0.000000e+00 : f32
      %134 = vector.broadcast %cst_76 : f32 to vector<1x512xf32>
      %c0_77 = arith.constant 0 : index
      %c0_78 = arith.constant 0 : index
      %135 = vector.load %arg21[%c0_77, %c0_78] : memref<1x512xf32, #tpu.memory_space<vmem>>, vector<1x512xf32>
      tpu.vector_store %arg21[%c0_77, %c0_78], %134 {strides = array<i32>} : memref<1x512xf32, #tpu.memory_space<vmem>>, vector<1x512xf32>,
      %cst_79 = arith.constant 0.000000e+00 : f32
      %136 = vector.broadcast %cst_79 : f32 to vector<1x512xf32>
      %c0_80 = arith.constant 0 : index
      %c0_81 = arith.constant 0 : index
      %137 = vector.load %arg22[%c0_80, %c0_81] : memref<1x512xf32, #tpu.memory_space<vmem>>, vector<1x512xf32>
      tpu.vector_store %arg22[%c0_80, %c0_81], %136 {strides = array<i32>} : memref<1x512xf32, #tpu.memory_space<vmem>>, vector<1x512xf32>,
    } else {
    }
    %c0_2 = arith.constant 0 : index
    %c0_3 = arith.constant 0 : index
    %4 = vector.load %arg24[%c0_2, %c0_3] : memref<3x512xf32, #tpu.memory_space<vmem>>, vector<3x512xf32>
    %5 = vector.broadcast %0 : f32 to vector<3x512xf32>
    %6 = arith.mulf %4, %5 : vector<3x512xf32>
    %c0_4 = arith.constant 0 : index
    %c0_5 = arith.constant 0 : index
    %7 = vector.load %arg23[%c0_4, %c0_5] : memref<3x512xf32, #tpu.memory_space<vmem>>, vector<3x512xf32>
    %cst = arith.constant 1.000000e+00 : f32
    %8 = arith.subf %cst, %0 : f32
    %9 = vector.broadcast %8 : f32 to vector<3x512xf32>
    %10 = arith.mulf %7, %9 : vector<3x512xf32>
    %11 = arith.addf %6, %10 : vector<3x512xf32>
    %c0_6 = arith.constant 0 : index
    %c0_7 = arith.constant 0 : index
    %12 = vector.load %arg7[%c0_6, %c0_7] : memref<32x3xf32, #tpu.memory_space<vmem>>, vector<32x3xf32>
    %13 = vector.extract_strided_slice %12 {offsets = [0, 0], sizes = [32, 1], strides = [1, 1]} : vector<32x3xf32> to vector<32x1xf32>
    %14 = vector.extract_strided_slice %11 {offsets = [0, 0], sizes = [1, 512], strides = [1, 1]} : vector<3x512xf32> to vector<1x512xf32>
    %15 = vector.broadcast %13 : vector<32x1xf32> to vector<32x512xf32>
    %16 = vector.broadcast %14 : vector<1x512xf32> to vector<32x512xf32>
    %17 = arith.mulf %15, %16 : vector<32x512xf32>
    %18 = vector.extract_strided_slice %12 {offsets = [0, 1], sizes = [32, 1], strides = [1, 1]} : vector<32x3xf32> to vector<32x1xf32>
    %19 = vector.extract_strided_slice %11 {offsets = [1, 0], sizes = [1, 512], strides = [1, 1]} : vector<3x512xf32> to vector<1x512xf32>
    %20 = vector.broadcast %18 : vector<32x1xf32> to vector<32x512xf32>
    %21 = vector.broadcast %19 : vector<1x512xf32> to vector<32x512xf32>
    %22 = arith.mulf %20, %21 : vector<32x512xf32>
    %23 = arith.addf %17, %22 : vector<32x512xf32>
    %24 = vector.extract_strided_slice %12 {offsets = [0, 2], sizes = [32, 1], strides = [1, 1]} : vector<32x3xf32> to vector<32x1xf32>
    %25 = vector.extract_strided_slice %11 {offsets = [2, 0], sizes = [1, 512], strides = [1, 1]} : vector<3x512xf32> to vector<1x512xf32>
    %26 = vector.broadcast %24 : vector<32x1xf32> to vector<32x512xf32>
    %27 = vector.broadcast %25 : vector<1x512xf32> to vector<32x512xf32>
    %28 = arith.mulf %26, %27 : vector<32x512xf32>
    %29 = arith.addf %23, %28 : vector<32x512xf32>
    %c0_8 = arith.constant 0 : index
    %c0_9 = arith.constant 0 : index
    %30 = vector.load %arg8[%c0_8, %c0_9] : memref<32x1xf32, #tpu.memory_space<vmem>>, vector<32x1xf32>
    %31 = vector.broadcast %30 : vector<32x1xf32> to vector<32x512xf32>
    %32 = arith.addf %29, %31 : vector<32x512xf32>
    %c0_10 = arith.constant 0 : index
    %c0_11 = arith.constant 0 : index
    %c0_12 = arith.constant 0 : index
    %33 = vector.load %arg5[%c0_10, %c0_11, %c0_12] : memref<1x3x512xbf16, #tpu.memory_space<vmem>>, vector<1x3x512xbf16>
    %34 = vector.shape_cast %33 : vector<1x3x512xbf16> to vector<3x512xbf16>
    %35 = arith.extf %34 : vector<3x512xbf16> to vector<3x512xf32>
    %c0_13 = arith.constant 0 : index
    %c0_14 = arith.constant 0 : index
    %36 = vector.load %arg9[%c0_13, %c0_14] : memref<16x3xf32, #tpu.memory_space<vmem>>, vector<16x3xf32>
    %37 = vector.extract_strided_slice %36 {offsets = [0, 0], sizes = [16, 1], strides = [1, 1]} : vector<16x3xf32> to vector<16x1xf32>
    %38 = vector.extract_strided_slice %35 {offsets = [0, 0], sizes = [1, 512], strides = [1, 1]} : vector<3x512xf32> to vector<1x512xf32>
    %39 = vector.broadcast %37 : vector<16x1xf32> to vector<16x512xf32>
    %40 = vector.broadcast %38 : vector<1x512xf32> to vector<16x512xf32>
    %41 = arith.mulf %39, %40 : vector<16x512xf32>
    %42 = vector.extract_strided_slice %36 {offsets = [0, 1], sizes = [16, 1], strides = [1, 1]} : vector<16x3xf32> to vector<16x1xf32>
    %43 = vector.extract_strided_slice %35 {offsets = [1, 0], sizes = [1, 512], strides = [1, 1]} : vector<3x512xf32> to vector<1x512xf32>
    %44 = vector.broadcast %42 : vector<16x1xf32> to vector<16x512xf32>
    %45 = vector.broadcast %43 : vector<1x512xf32> to vector<16x512xf32>
    %46 = arith.mulf %44, %45 : vector<16x512xf32>
    %47 = arith.addf %41, %46 : vector<16x512xf32>
    %48 = vector.extract_strided_slice %36 {offsets = [0, 2], sizes = [16, 1], strides = [1, 1]} : vector<16x3xf32> to vector<16x1xf32>
    %49 = vector.extract_strided_slice %35 {offsets = [2, 0], sizes = [1, 512], strides = [1, 1]} : vector<3x512xf32> to vector<1x512xf32>
    %50 = vector.broadcast %48 : vector<16x1xf32> to vector<16x512xf32>
    %51 = vector.broadcast %49 : vector<1x512xf32> to vector<16x512xf32>
    %52 = arith.mulf %50, %51 : vector<16x512xf32>
    %53 = arith.addf %47, %52 : vector<16x512xf32>
    %c0_15 = arith.constant 0 : index
    %c0_16 = arith.constant 0 : index
    %54 = vector.load %arg10[%c0_15, %c0_16] : memref<16x1xf32, #tpu.memory_space<vmem>>, vector<16x1xf32>
    %55 = vector.broadcast %54 : vector<16x1xf32> to vector<16x512xf32>
    %56 = arith.addf %53, %55 : vector<16x512xf32>
    %c0_17 = arith.constant 0 : index
    %c0_18 = arith.constant 0 : index
    %57 = vector.load %arg11[%c0_17, %c0_18] : memref<16x32xf32, #tpu.memory_space<vmem>>, vector<16x32xf32>
    %cst_19 = arith.constant dense<0.000000e+00> : vector<16x512xf32>
    %58 = tpu.matmul %57, %32, %cst_19 {dimension_numbers = #tpu.dot_dimension_numbers<[1], [0], [0], [1], [0, 0, 1, 1], [], []>} : vector<16x32xf32>, vector<32x512xf32>, vector<16x512xf32> -> vector<16x512xf32>
    %c0_20 = arith.constant 0 : index
    %c0_21 = arith.constant 0 : index
    %59 = vector.load %arg12[%c0_20, %c0_21] : memref<16x16xf32, #tpu.memory_space<vmem>>, vector<16x16xf32>
    %cst_22 = arith.constant dense<0.000000e+00> : vector<16x512xf32>
    %60 = tpu.matmul %59, %56, %cst_22 {dimension_numbers = #tpu.dot_dimension_numbers<[1], [0], [0], [1], [0, 0, 1, 1], [], []>} : vector<16x16xf32>, vector<16x512xf32>, vector<16x512xf32> -> vector<16x512xf32>
    %61 = arith.addf %58, %60 : vector<16x512xf32>
    %c0_23 = arith.constant 0 : index
    %c0_24 = arith.constant 0 : index
    %62 = vector.load %arg13[%c0_23, %c0_24] : memref<16x1xf32, #tpu.memory_space<vmem>>, vector<16x1xf32>
    %63 = vector.broadcast %62 : vector<16x1xf32> to vector<16x512xf32>
    %64 = arith.addf %61, %63 : vector<16x512xf32>
    %65 = vector.extract_strided_slice %64 {offsets = [0, 0], sizes = [8, 512], strides = [1, 1]} : vector<16x512xf32> to vector<8x512xf32>
    %66 = vector.extract_strided_slice %64 {offsets = [8, 0], sizes = [8, 512], strides = [1, 1]} : vector<16x512xf32> to vector<8x512xf32>
    %cst_25 = arith.constant 5.000000e-01 : f32
    %67 = vector.broadcast %cst_25 : f32 to vector<8x512xf32>
    %68 = arith.mulf %67, %66 : vector<8x512xf32>
    %69 = math.exp %68 : vector<8x512xf32>
    %c0_26 = arith.constant 0 : index
    %c0_27 = arith.constant 0 : index
    %c0_28 = arith.constant 0 : index
    %70 = vector.load %arg6[%c0_26, %c0_27, %c0_28] : memref<1x8x512xbf16, #tpu.memory_space<vmem>>, vector<1x8x512xbf16>
    %71 = vector.shape_cast %70 : vector<1x8x512xbf16> to vector<8x512xbf16>
    %72 = arith.extf %71 : vector<8x512xbf16> to vector<8x512xf32>
    %73 = arith.mulf %69, %72 : vector<8x512xf32>
    %74 = arith.addf %65, %73 : vector<8x512xf32>
    %c0_29 = arith.constant 0 : index
    %c0_30 = arith.constant 0 : index
    %75 = vector.load %arg14[%c0_29, %c0_30] : memref<32x32xf32, #tpu.memory_space<vmem>>, vector<32x32xf32>
    %cst_31 = arith.constant dense<0.000000e+00> : vector<32x512xf32>
    %76 = tpu.matmul %75, %32, %cst_31 {dimension_numbers = #tpu.dot_dimension_numbers<[1], [0], [0], [1], [0, 0, 1, 1], [], []>} : vector<32x32xf32>, vector<32x512xf32>, vector<32x512xf32> -> vector<32x512xf32>
    %c0_32 = arith.constant 0 : index
    %c0_33 = arith.constant 0 : index
    %77 = vector.load %arg15[%c0_32, %c0_33] : memref<32x16xf32, #tpu.memory_space<vmem>>, vector<32x16xf32>
    %cst_34 = arith.constant dense<0.000000e+00> : vector<32x512xf32>
    %78 = tpu.matmul %77, %56, %cst_34 {dimension_numbers = #tpu.dot_dimension_numbers<[1], [0], [0], [1], [0, 0, 1, 1], [], []>} : vector<32x16xf32>, vector<16x512xf32>, vector<32x512xf32> -> vector<32x512xf32>
    %79 = arith.addf %76, %78 : vector<32x512xf32>
    %c0_35 = arith.constant 0 : index
    %c0_36 = arith.constant 0 : index
    %80 = vector.load %arg16[%c0_35, %c0_36] : memref<32x8xf32, #tpu.memory_space<vmem>>, vector<32x8xf32>
    %cst_37 = arith.constant dense<0.000000e+00> : vector<32x512xf32>
    %81 = tpu.matmul %80, %74, %cst_37 {dimension_numbers = #tpu.dot_dimension_numbers<[1], [0], [0], [1], [0, 0, 1, 1], [], []>} : vector<32x8xf32>, vector<8x512xf32>, vector<32x512xf32> -> vector<32x512xf32>
    %82 = arith.addf %79, %81 : vector<32x512xf32>
    %c0_38 = arith.constant 0 : index
    %c0_39 = arith.constant 0 : index
    %83 = vector.load %arg17[%c0_38, %c0_39] : memref<32x1xf32, #tpu.memory_space<vmem>>, vector<32x1xf32>
    %84 = vector.broadcast %83 : vector<32x1xf32> to vector<32x512xf32>
    %85 = arith.addf %82, %84 : vector<32x512xf32>
    %c0_40 = arith.constant 0 : index
    %c0_41 = arith.constant 0 : index
    %86 = vector.load %arg18[%c0_40, %c0_41] : memref<3x32xf32, #tpu.memory_space<vmem>>, vector<3x32xf32>
    %cst_42 = arith.constant dense<0.000000e+00> : vector<3x512xf32>
    %87 = tpu.matmul %86, %85, %cst_42 {dimension_numbers = #tpu.dot_dimension_numbers<[1], [0], [0], [1], [0, 0, 1, 1], [], []>} : vector<3x32xf32>, vector<32x512xf32>, vector<3x512xf32> -> vector<3x512xf32>
    %c0_43 = arith.constant 0 : index
    %c0_44 = arith.constant 0 : index
    %88 = vector.load %arg19[%c0_43, %c0_44] : memref<3x1xf32, #tpu.memory_space<vmem>>, vector<3x1xf32>
    %89 = vector.broadcast %88 : vector<3x1xf32> to vector<3x512xf32>
    %90 = arith.addf %87, %89 : vector<3x512xf32>
    %c0_45 = arith.constant 0 : index
    %c0_46 = arith.constant 0 : index
    %c0_47 = arith.constant 0 : index
    %91 = vector.load %arg4[%c0_45, %c0_46, %c0_47] : memref<1x3x512xbf16, #tpu.memory_space<vmem>>, vector<1x3x512xbf16>
    %92 = vector.shape_cast %91 : vector<1x3x512xbf16> to vector<3x512xbf16>
    %93 = arith.extf %92 : vector<3x512xbf16> to vector<3x512xf32>
    %94 = arith.subf %90, %93 : vector<3x512xf32>
    %95 = arith.mulf %94, %94 : vector<3x512xf32>
    %cst_48 = arith.constant dense<0.000000e+00> : vector<512xf32>
    %96 = vector.multi_reduction <add>, %95, %cst_48 [0] : vector<3x512xf32> to vector<512xf32>
    %97 = vector.shape_cast %96 : vector<512xf32> to vector<1x512xf32>
    %cst_49 = arith.constant 1.000000e+00 : f32
    %98 = vector.broadcast %cst_49 : f32 to vector<8x512xf32>
    %99 = arith.addf %98, %66 : vector<8x512xf32>
    %100 = arith.mulf %65, %65 : vector<8x512xf32>
    %101 = arith.subf %99, %100 : vector<8x512xf32>
    %102 = math.exp %66 : vector<8x512xf32>
    %103 = arith.subf %101, %102 : vector<8x512xf32>
    %cst_50 = arith.constant dense<0.000000e+00> : vector<512xf32>
    %104 = vector.multi_reduction <add>, %103, %cst_50 [0] : vector<8x512xf32> to vector<512xf32>
    %105 = vector.shape_cast %104 : vector<512xf32> to vector<1x512xf32>
    %106 = tpu.iota {dimensions = array<i32: 1>} : vector<1x512xi32>
    %c512_i32 = arith.constant 512 : i32
    %107 = arith.muli %arg0, %c512_i32 : i32
    %108 = vector.broadcast %107 : i32 to vector<1x512xi32>
    %109 = arith.addi %108, %106 : vector<1x512xi32>
    %c768_i32 = arith.constant 768 : i32
    %110 = vector.broadcast %c768_i32 : i32 to vector<1x512xi32>
    %111 = arith.cmpi slt, %109, %110 : vector<1x512xi32>
    %cst_51 = arith.constant 0.000000e+00 : f32
    %112 = vector.broadcast %cst_51 : f32 to vector<1x512xf32>
    %113 = arith.select %111, %97, %112 : vector<1x512xi1>, vector<1x512xf32>
    %cst_52 = arith.constant 0.000000e+00 : f32
    %114 = vector.broadcast %cst_52 : f32 to vector<1x512xf32>
    %115 = arith.select %111, %105, %114 : vector<1x512xi1>, vector<1x512xf32>
    %c0_53 = arith.constant 0 : index
    %c0_54 = arith.constant 0 : index
    %116 = vector.load %arg20[%c0_53, %c0_54] : memref<1x512xf32, #tpu.memory_space<vmem>>, vector<1x512xf32>
    %117 = arith.addf %116, %113 : vector<1x512xf32>
    %c0_55 = arith.constant 0 : index
    %c0_56 = arith.constant 0 : index
    %118 = vector.load %arg20[%c0_55, %c0_56] : memref<1x512xf32, #tpu.memory_space<vmem>>, vector<1x512xf32>
    tpu.vector_store %arg20[%c0_55, %c0_56], %117 {strides = array<i32>} : memref<1x512xf32, #tpu.memory_space<vmem>>, vector<1x512xf32>,
    %c0_57 = arith.constant 0 : index
    %c0_58 = arith.constant 0 : index
    %119 = vector.load %arg21[%c0_57, %c0_58] : memref<1x512xf32, #tpu.memory_space<vmem>>, vector<1x512xf32>
    %120 = arith.addf %119, %115 : vector<1x512xf32>
    %c0_59 = arith.constant 0 : index
    %c0_60 = arith.constant 0 : index
    %121 = vector.load %arg21[%c0_59, %c0_60] : memref<1x512xf32, #tpu.memory_space<vmem>>, vector<1x512xf32>
    tpu.vector_store %arg21[%c0_59, %c0_60], %120 {strides = array<i32>} : memref<1x512xf32, #tpu.memory_space<vmem>>, vector<1x512xf32>,
    %c4_i32 = arith.constant 4 : i32
    %122 = arith.cmpi eq, %arg1, %c4_i32 : i32
    %123 = arith.extui %122 : i1 to i32
    %c0_i32_61 = arith.constant 0 : i32
    %124 = arith.cmpi ne, %123, %c0_i32_61 : i32
    scf.if %124 {
      %c0_66 = arith.constant 0 : index
      %c0_67 = arith.constant 0 : index
      %127 = vector.load %arg22[%c0_66, %c0_67] : memref<1x512xf32, #tpu.memory_space<vmem>>, vector<1x512xf32>
      tpu.vector_store %arg22[%c0_66, %c0_67], %113 {strides = array<i32>} : memref<1x512xf32, #tpu.memory_space<vmem>>, vector<1x512xf32>,
    } else {
    }
    %c0_62 = arith.constant 0 : index
    %c0_63 = arith.constant 0 : index
    %125 = vector.load %arg23[%c0_62, %c0_63] : memref<3x512xf32, #tpu.memory_space<vmem>>, vector<3x512xf32>
    tpu.vector_store %arg23[%c0_62, %c0_63], %90 {strides = array<i32>} : memref<3x512xf32, #tpu.memory_space<vmem>>, vector<3x512xf32>,
    %c0_64 = arith.constant 0 : index
    %c0_65 = arith.constant 0 : index
    %126 = vector.load %arg24[%c0_64, %c0_65] : memref<3x512xf32, #tpu.memory_space<vmem>>, vector<3x512xf32>
    tpu.vector_store %arg24[%c0_64, %c0_65], %93 {strides = array<i32>} : memref<3x512xf32, #tpu.memory_space<vmem>>, vector<3x512xf32>,
    return
  }
  func.func @transform_0(%arg0: i32, %arg1: i32) -> (i32, i32) {
    %c0_i32 = arith.constant 0 : i32
    %c0_i32_0 = arith.constant 0 : i32
    %c0_i32_1 = arith.constant 0 : i32
    return %c0_i32, %c0_i32_0 : i32, i32
  }
  func.func @transform_1(%arg0: i32, %arg1: i32) -> (i32, i32, i32) {
    %c0_i32 = arith.constant 0 : i32
    %c0_i32_0 = arith.constant 0 : i32
    %c0_i32_1 = arith.constant 0 : i32
    return %c0_i32, %c0_i32_0, %arg0 : i32, i32, i32
  }
  func.func @transform_2(%arg0: i32, %arg1: i32) -> (i32, i32, i32) {
    %c1_i32 = arith.constant 1 : i32
    %0 = arith.addi %arg1, %c1_i32 : i32
    %c0_i32 = arith.constant 0 : i32
    %c0_i32_0 = arith.constant 0 : i32
    return %0, %c0_i32, %arg0 : i32, i32, i32
  }
  func.func @transform_3(%arg0: i32, %arg1: i32) -> (i32, i32, i32) {
    %c1_i32 = arith.constant 1 : i32
    %0 = arith.addi %arg1, %c1_i32 : i32
    %c0_i32 = arith.constant 0 : i32
    %c0_i32_0 = arith.constant 0 : i32
    return %0, %c0_i32, %arg0 : i32, i32, i32
  }
  func.func @transform_4(%arg0: i32, %arg1: i32) -> (i32, i32, i32) {
    %c0_i32 = arith.constant 0 : i32
    %c0_i32_0 = arith.constant 0 : i32
    return %arg1, %c0_i32, %arg0 : i32, i32, i32
  }
  func.func @transform_5(%arg0: i32, %arg1: i32) -> (i32, i32) {
    %c0_i32 = arith.constant 0 : i32
    %c0_i32_0 = arith.constant 0 : i32
    %c0_i32_1 = arith.constant 0 : i32
    return %c0_i32, %c0_i32_0 : i32, i32
  }
  func.func @transform_6(%arg0: i32, %arg1: i32) -> (i32, i32) {
    %c0_i32 = arith.constant 0 : i32
    %c0_i32_0 = arith.constant 0 : i32
    %c0_i32_1 = arith.constant 0 : i32
    return %c0_i32, %c0_i32_0 : i32, i32
  }
  func.func @transform_7(%arg0: i32, %arg1: i32) -> (i32, i32) {
    %c0_i32 = arith.constant 0 : i32
    %c0_i32_0 = arith.constant 0 : i32
    %c0_i32_1 = arith.constant 0 : i32
    return %c0_i32, %c0_i32_0 : i32, i32
  }
  func.func @transform_8(%arg0: i32, %arg1: i32) -> (i32, i32) {
    %c0_i32 = arith.constant 0 : i32
    %c0_i32_0 = arith.constant 0 : i32
    %c0_i32_1 = arith.constant 0 : i32
    return %c0_i32, %c0_i32_0 : i32, i32
  }
  func.func @transform_9(%arg0: i32, %arg1: i32) -> (i32, i32) {
    %c0_i32 = arith.constant 0 : i32
    %c0_i32_0 = arith.constant 0 : i32
    %c0_i32_1 = arith.constant 0 : i32
    return %c0_i32, %c0_i32_0 : i32, i32
  }
  func.func @transform_10(%arg0: i32, %arg1: i32) -> (i32, i32) {
    %c0_i32 = arith.constant 0 : i32
    %c0_i32_0 = arith.constant 0 : i32
    %c0_i32_1 = arith.constant 0 : i32
    return %c0_i32, %c0_i32_0 : i32, i32
  }
  func.func @transform_11(%arg0: i32, %arg1: i32) -> (i32, i32) {
    %c0_i32 = arith.constant 0 : i32
    %c0_i32_0 = arith.constant 0 : i32
    %c0_i32_1 = arith.constant 0 : i32
    return %c0_i32, %c0_i32_0 : i32, i32
  }
  func.func @transform_12(%arg0: i32, %arg1: i32) -> (i32, i32) {
    %c0_i32 = arith.constant 0 : i32
    %c0_i32_0 = arith.constant 0 : i32
    %c0_i32_1 = arith.constant 0 : i32
    return %c0_i32, %c0_i32_0 : i32, i32
  }
  func.func @transform_13(%arg0: i32, %arg1: i32) -> (i32, i32) {
    %c0_i32 = arith.constant 0 : i32
    %c0_i32_0 = arith.constant 0 : i32
    %c0_i32_1 = arith.constant 0 : i32
    return %c0_i32, %c0_i32_0 : i32, i32
  }
  func.func @transform_14(%arg0: i32, %arg1: i32) -> (i32, i32) {
    %c0_i32 = arith.constant 0 : i32
    %c0_i32_0 = arith.constant 0 : i32
    %c0_i32_1 = arith.constant 0 : i32
    return %c0_i32, %c0_i32_0 : i32, i32
  }
  func.func @transform_15(%arg0: i32, %arg1: i32) -> (i32, i32) {
    %c0_i32 = arith.constant 0 : i32
    %c0_i32_0 = arith.constant 0 : i32
    %c0_i32_1 = arith.constant 0 : i32
    return %c0_i32, %c0_i32_0 : i32, i32
  }
  func.func @transform_16(%arg0: i32, %arg1: i32) -> (i32, i32) {
    %c0_i32 = arith.constant 0 : i32
    %c0_i32_0 = arith.constant 0 : i32
    %c0_i32_1 = arith.constant 0 : i32
    return %c0_i32, %c0_i32_0 : i32, i32
  }
  func.func @transform_17(%arg0: i32, %arg1: i32) -> (i32, i32) {
    %c0_i32 = arith.constant 0 : i32
    %c0_i32_0 = arith.constant 0 : i32
    %c0_i32_1 = arith.constant 0 : i32
    return %c0_i32, %c0_i32_0 : i32, i32
  }
  func.func @transform_18(%arg0: i32, %arg1: i32) -> (i32, i32) {
    %c0_i32 = arith.constant 0 : i32
    %c0_i32_0 = arith.constant 0 : i32
    return %c0_i32, %arg0 : i32, i32
  }
  func.func @transform_19(%arg0: i32, %arg1: i32) -> (i32, i32) {
    %c0_i32 = arith.constant 0 : i32
    %c0_i32_0 = arith.constant 0 : i32
    return %c0_i32, %arg0 : i32, i32
  }
  func.func @transform_20(%arg0: i32, %arg1: i32) -> (i32, i32) {
    %c0_i32 = arith.constant 0 : i32
    %c0_i32_0 = arith.constant 0 : i32
    return %c0_i32, %arg0 : i32, i32
  }
}

</mosaic_0001>

<bundles_post_ra>
// kernel: vae_training_one_step.1
= control target key start
LH: loop header
LB: loop body
LE: loop exit
PB: predicated region body
PF: predicated region fallthrough
CT: control target
= control target key end

     0   :  { %s3236_s24 = smov 0   ;;  %s3240_s25 = smov 0   ;;  %s3884_s0 = inlined_call_operand.<no memory space> [shape: f32[1,1], index: 0, kind: input, shape index: {}]   ;;  %s3885_s1 = inlined_call_operand.vmem [shape: bf16[6,3,1024], index: 1, kind: input, shape index: {}, may-alias: {1,2}]   ;;  %s3886_s2 = inlined_call_operand.vmem [shape: bf16[6,3,1024], index: 2, kind: input, shape index: {}, may-alias: {1,2}]   ;;  %s3887_s3 = inlined_call_operand.vmem [shape: bf16[6,3,1024], index: 3, kind: input, shape index: {}]   ;;  %s3888_s4 = inlined_call_operand.vmem [shape: bf16[5,8,1024], index: 4, kind: input, shape index: {}]   ;;  %s3889_s5 = inlined_call_operand.vmem [shape: f32[32,3], index: 5, kind: input, shape index: {}]   ;;  %s3890_s6 = inlined_call_operand.vmem [shape: f32[32,1], index: 6, kind: input, shape index: {}]   ;;  %s3891_s7 = inlined_call_operand.vmem [shape: f32[16,3], index: 7, kind: input, shape index: {}]   ;;  %s3892_s8 = inlined_call_operand.vmem [shape: f32[16,1], index: 8, kind: input, shape index: {}]   ;;  %s3893_s9 = inlined_call_operand.vmem [shape: f32[16,32], index: 9, kind: input, shape index: {}]   ;;  %s3894_s10 = inlined_call_operand.vmem [shape: f32[16,16], index: 10, kind: input, shape index: {}]   ;;  %s3895_s11 = inlined_call_operand.vmem [shape: f32[16,1], index: 11, kind: input, shape index: {}]   ;;  %s3896_s12 = inlined_call_operand.vmem [shape: f32[32,32], index: 12, kind: input, shape index: {}]   ;;  %s3897_s13 = inlined_call_operand.vmem [shape: f32[32,16], index: 13, kind: input, shape index: {}]   ;;  %s3898_s14 = inlined_call_operand.vmem [shape: f32[32,8], index: 14, kind: input, shape index: {}]   ;;  %s3899_s15 = inlined_call_operand.vmem [shape: f32[32,1], index: 15, kind: input, shape index: {}]   ;;  %s3900_s16 = inlined_call_operand.vmem [shape: f32[3,32], index: 16, kind: input, shape index: {}]   ;;  %s3901_s17 = inlined_call_operand.vmem [shape: f32[3,1], index: 17, kind: input, shape index: {}]   ;;  %s3902_s18 = inlined_call_operand.vmem [shape: f32[1,1024], index: 18, kind: output, shape index: {0}]   ;;  %s3903_s19 = inlined_call_operand.vmem [shape: f32[1,1024], index: 19, kind: output, shape index: {1}]   ;;  %s3904_s20 = inlined_call_operand.vmem [shape: f32[1,1024], index: 20, kind: output, shape index: {2}]  }
   0x1   :  { %3918 = sst [smem:[#allocation11_spill]] %s3884_s0  ;;  %s3244_s26 = smov 0  }
   0x2   :  { %3919 = sst [smem:[#allocation12_spill]] %s3885_s1  ;;  %s3932_s23 = sld [smem:[#allocation11_spill]] }
   0x3   :  { %3920 = sst [smem:[#allocation13_spill]] %s3886_s2  ;;  %s3238_s2 = smov 0  }
   0x4   :  { %3921 = sst [smem:[#allocation14_spill]] %s3887_s3  ;;  %s3242_s3 = smov 0  }
   0x5   :  { %3922 = sst [smem:[#allocation15_spill]] %s3888_s4 }
   0x6   :  { %3923 = sst [smem:[#allocation16_spill]] %s3893_s9 }
   0x7   :  { %3924 = sst [smem:[#allocation17_spill]] %s3894_s10 }
   0x8   :  { %3925 = sst [smem:[#allocation18_spill]] %s3896_s12 }
   0x9   :  { %3926 = sst [smem:[#allocation19_spill]] %s3897_s13 }
   0xa   :  { %3927 = sst [smem:[#allocation20_spill]] %s3898_s14 }
   0xb   :  { %3928 = sst [smem:[#allocation21_spill]] %s3900_s16 }
   0xc   :  { %3929 = sst [smem:[#allocation22_spill]] %s3901_s17 }
   0xd   :  { %3930 = sst [smem:[#allocation23_spill]] %s3902_s18 }
   0xe   :  { %3931 = sst [smem:[#allocation24_spill]] %s3903_s19 }
   0xf   :  { %26 = sst [smem:[#allocation4]] %s3932_s23 }
  0x10 LB: > { %3933 = sst [smem:[#allocation5_spill]] %s3108_s2  ;;  %s41_s27 = sadd.s32 1, %s3112_s25  ;;  %s3120_s26 = sphi %s3244_s26, %s32_s26   ;;  %s3116_s3 = sphi %s3242_s3, %s3963_s3   ;;  %s3112_s25 = sphi %s3240_s25, %s3962_s25   ;;  %s3108_s2 = sphi %s3238_s2, %s3961_s2   ;;  %s3104_s24 = sphi %s3236_s24, %s3960_s24  }
  0x11   : > { %3934 = sst [smem:[#allocation6_spill]] %s3112_s25  ;;  %s44_s28 = sadd.s32 1, %s3116_s3 }
  0x12   : > { %3935 = sst [smem:[#allocation7_spill]] %s3116_s3  ;;  %p42_p0 = scmp.ge.s32.totalorder %s41_s27, 5 }
  0x13   : > { %3936 = sst [smem:[#allocation8_spill]] %s3120_s26  ;;  %p2849_p1 = scmp.ge.s32.totalorder %s3120_s26, 1 }
  0x14   : > { %p640_p2 = scmp.lt.s32.totalorder %s3120_s26, 11  ;;  %s3965_s27 = smov (%p42_p0, %s41_s27), 0 }
  0x15   : > { %3937 = sst [smem:[#allocation9_spill]] %s3965_s27  ;;  %s3967_s28 = smov (!%p42_p0, %s44_s28), %s3116_s3 }
  0x16   : > { %p641_p3 = pnand %p2849_p1, %p640_p2  ;;  %p46_p4 = scmp.ge.s32.totalorder %s3967_s28, 2 }
  0x17   : > { %s2850_s4 = sshll.u32 (!%p641_p3), %s3108_s2, 2  ;;  %s740_s29 = sadd.s32 (!%p641_p3), 1, %s3104_s24 }
  0x18   : > { %s3969_s28 = smov (%p46_p4, %s3967_s28), 0  ;;  %644 = sbr.rel (%p641_p3) target bundleno = 970 (0x3ca), region = 92 }
  0x19   : > { %3938 = sst [smem:[#allocation10_spill]] %s3969_s28  ;;  %p735_p5 = scmp.lt.s32.totalorder (!%p641_p3), %s2850_s4, 7 }
  0x1a   : > { %p742_p6 = scmp.lt.s32.totalorder (!%p641_p3), %s740_s29, 5  ;;  %p765_p7 = scmp.lt.s32.totalorder (!%p641_p3), %s3104_s24, 4 }
  0x1b   : > { %s3273_s30 = sld [smem:[#allocation4]] (!%p641_p3)  ;;  %s3939_s18 = sld [smem:[#allocation23_spill]] (!%p641_p3) }
  0x1c   : > { %s3940_s27 = sld [smem:[#allocation12_spill]] (!%p641_p3)  ;;  %s3941_s19 = sld [smem:[#allocation24_spill]] (!%p641_p3) }
  0x1d   : > { %s3944_s9 = sld [smem:[#allocation15_spill]] (!%p641_p3)  ;;  %p2864_p8 = scmp.ne.s32.totalorder (!%p641_p3), %s3104_s24, 0 }
  0x1f   : > { %s3971_s4 = smov (!%p735_p5, %s2850_s4), 7  ;;  %s3973_s29 = smov (!%p742_p6, %s740_s29), 5 }
  0x20   : > { %s2851_s0 = sshll.u32 %s3971_s4, 1  ;;  %s2853_s25 = sshll.u32 %s3973_s29, 3  ;;  %v801_v1 = vlaneseq (!%p2864_p8)  ;;  %v3122_v4 = vmov (!%p2864_p8), 0.0  }
  0x21   : > { %s3278_s22 = scalar_lea.vmem %s3939_s18, %s3971_s4  ;;  %s747_s26 = sadd.s32 %s2853_s25, %s3971_s4 }
  0x22   : > { %s738_s3 = scalar_lea.vmem %s3940_s27, %s2851_s0  ;;  %s3286_s2 = scalar_lea.vmem %s3941_s19, %s3971_s4  ;;  %vm803_vm0 = vcmp.lt.s32.totalorder (!%p2864_p8), %v801_v1, 512 }
  0x23   : > { %s2854_s12 = sshll.u32 %s747_s26, 1  ;;  %s3291_s10 = scalar_lea.vmem %s3904_s20, %s3971_s4  ;;  %v794_v0 = vld [vmem:[%s738_s3] sm:$0xff] (!%p2864_p8)  ;;  %805 = vst.msk [vmem:[%s3278_s22] sm:$0xf] (!%p2864_p8), %vm803_vm0, %v3122_v4  ;;  %806 = vst.msk [vmem:[%s3286_s2] sm:$0xf] (!%p2864_p8), %vm803_vm0, %v3122_v4 }
  0x24   : > { %s3942_s18 = sld [smem:[#allocation13_spill]]  ;;  %s3943_s29 = sld [smem:[#allocation14_spill]]  ;;  %v795_v2 = vunpack.c.l.bf16 (!%p2864_p8), %v794_v0  ;;  %v796_v3 = vunpack.c.h.bf16 (!%p2864_p8), %v794_v0  ;;  %807 = vst.msk [vmem:[%s3291_s10] sm:$0xf] (!%p2864_p8), %vm803_vm0, %v3122_v4 }
  0x25   : > { %s766_s14 = scalar_select %p765_p7, %s3104_s24, 4 }
  0x26   : > { %793 = sbr.rel (%p2864_p8) target bundleno = 45 (0x2d), region = 96  ;;  %797 = vst [vmem:[#allocation2] sm:$0x77] (!%p2864_p8), %v795_v2  ;;  %799 = vst [vmem:[#allocation3] sm:$0x77] (!%p2864_p8), %v795_v2 }
  0x27   : > { %s2859_s16 = sshll.u32 %s766_s14, 3  ;;  %798 = vst [vmem:[#allocation2 + $0x8] sm:$0x77] (!%p2864_p8), %v796_v3  ;;  %800 = vst [vmem:[#allocation3 + $0x8] sm:$0x77] (!%p2864_p8), %v796_v3 }
  0x28   : > { %s770_s0 = sadd.s32 %s2859_s16, %s3971_s4 }
  0x29   : > { %s2860_s26 = sshll.u32 %s770_s0, 2 }
  0x2a   : > { %s3296_s17 = scalar_lea.vmem %s3942_s18, %s2854_s12  ;;  %s3301_s25 = scalar_lea.vmem %s3943_s29, %s2854_s12 }
  0x2b   : > { %s3309_s13 = scalar_lea.vmem %s3944_s9, %s2860_s26 }
  0x2d PF: > { %v1110_v5 = vld [vmem:[%s3891_s7] sm:$0xff]  ;;  %v3123_v6 = vmov 1   ;;  %v3124_v7 = vmov 0   ;;  %v1111_v8 = vld [vmem:[%s3891_s7 + $0x8] sm:$0xff]  ;;  %v3125_v10 = vmov 2   ;;  %v823_v13 = vld [vmem:[%s3889_s5 + $0x10] sm:$0xff]  ;;  %v3914_v30 = vlaneseq }
  0x2e   : > { %3054 = vset.pattern.permute.xlu1 %v3123_v6  ;;  %3053 = vset.pattern.permute.xlu0 %v3124_v7  ;;  %v822_v9 = vld [vmem:[%s3889_s5 + $0x8] sm:$0xff]  ;;  %v821_v12 = vld [vmem:[%s3889_s5] sm:$0xff]  ;;  %v824_v14 = vld [vmem:[%s3889_s5 + $0x18] sm:$0xff]  ;;  %v3916_v23 = vmov 0.0   ;;  %s3945_s1 = sld [smem:[#allocation22_spill]]  ;;  %s815_s28 = ssub.f32 1.0, %s3273_s30  ;;  %v810_v40 = vstv %s3273_s30 }
  0x2f   : > { %1169 = vperm.xlu1 %3054, %v1110_v5   ;;  %1114 = vperm.xlu0 %3053, %v1110_v5   ;;  %v1289_v11 = vld [vmem:[%s3892_s8 + $0x8] sm:$0xff]  ;;  %v1288_v15 = vld [vmem:[%s3892_s8] sm:$0xff]  ;;  %v1069_v16 = vld [vmem:[%s3890_s6 + $0x10] sm:$0xff]  ;;  %v3383_v33 = vshrl.u32 %v3914_v30, 7  ;;  %s3946_s27 = sld [smem:[#allocation17_spill]]  ;;  %vm1312_vm1 = vcmask 130048  }
  0x30   : > { %v1634_v17 = vld [vmem:[%s3895_s11] sm:$0xff]  ;;  %v2280_v18 = vld [vmem:[%s3899_s15 + $0x8] sm:$0xff]  ;;  %v2282_v19 = vld [vmem:[%s3899_s15 + $0x18] sm:$0xff]  ;;  %1383 = vmatprep.mubr.f32.mxu0 %v3916_v23  ;;  %1460 = vmatprep.mubr.f32.mxu1 %v3916_v23  ;;  %v816_v42 = vstv %s815_s28  ;;  %s3948_s26 = sld [smem:[#allocation16_spill]]  ;;  %vm1473_vm2 = vcmask 261120   ;;  %s3950_s3 = sld [smem:[#allocation19_spill]] }
  0x31   : > { %v1067_v20 = vld [vmem:[%s3890_s6] sm:$0xff]  ;;  %v1068_v21 = vld [vmem:[%s3890_s6 + $0x8] sm:$0xff]  ;;  %v1070_v22 = vld [vmem:[%s3890_s6 + $0x18] sm:$0xff]  ;;  %v3390_v37 = vsub.s32 1, %v3383_v33  ;;  %v3396_v44 = vsub.s32 0, %v3383_v33  ;;  %v3399_v45 = vsub.s32 5, %v3383_v33 }
  0x32   : > { %v1635_v24 = vld [vmem:[%s3895_s11 + $0x8] sm:$0xff]  ;;  %v2279_v25 = vld [vmem:[%s3899_s15] sm:$0xff]  ;;  %v2281_v26 = vld [vmem:[%s3899_s15 + $0x10] sm:$0xff]  ;;  %v3402_v48 = vsub.s32 2, %v3383_v33  ;;  %v3405_v49 = vsub.s32 4, %v3383_v33  ;;  %v3408_v50 = vsub.s32 6, %v3383_v33 }
  0x33   : > { %1173 = vperm.xlu1 %3054, %v1111_v8   ;;  %1119 = vperm.xlu0 %3053, %v1111_v8   ;;  %v1107_v34 = vld [vmem:[%s3301_s25] sm:$0xff]  ;;  %v808_v39 = vld [vmem:[#allocation3] sm:$0x77]  ;;  %v809_v46 = vld [vmem:[#allocation3 + $0x8] sm:$0x77]  ;;  %s3952_s0 = sld [smem:[#allocation18_spill]] }
  0x34   : > { %v2320_v27 = vld [vmem:[%s3945_s1] sm:$0x7]  ;;  %v1108_v36 = vunpack.c.l.bf16 %v1107_v34  ;;  %v1109_v43 = vunpack.c.h.bf16 %v1107_v34  ;;  %v814_v47 = vld [vmem:[#allocation2 + $0x8] sm:$0x77]  ;;  %v811_v51 = vmul.f32 %v810_v40, %v808_v39  ;;  %v812_v54 = vmul.f32 %v810_v40, %v809_v46  ;;  %s3953_s21 = sld [smem:[#allocation5_spill]]  ;;  %s3955_s30 = sld [smem:[#allocation20_spill]] }
  0x35   : > { %v813_v41 = vld [vmem:[#allocation2] sm:$0x77]  ;;  %v818_v55 = vmul.f32 %v816_v42, %v814_v47  ;;  %vm2072_vm3 = vcmask 64512   ;;  %s3958_s18 = sld [smem:[#allocation21_spill]]  ;;  %vm2488_vm9 = vcmask 1042432   ;;  %p2900_p9 = scmp.ne.s32.totalorder %s3104_s24, 4 }
  0x36   : > { %v817_v52 = vmul.f32 %v816_v42, %v813_v41  ;;  %v1179_v53 = vrot.slane %v1108_v36, %v3390_v37  ;;  %v1183_v57 = vrot.slane %v1108_v36, %v3399_v45  ;;  %v1187_v58 = vrot.slane %v1109_v43, %v3390_v37  ;;  %s3949_s23 = smov %s3948_s26  ;;  %s3951_s4 = smov %s3950_s3 }
  0x37   : > { %3055 = vset.pattern.permute.xlu1 %v3125_v10  ;;  %832 = vperm.xlu0 %3053, %v822_v9   ;;  %v1191_v59 = vrot.slane %v1109_v43, %v3399_v45  ;;  %v1127_v60 = vrot.slane %v1108_v36, %v3396_v44  ;;  %v1131_v62 = vrot.slane %v1108_v36, %v3405_v49 }
  0x38   : > { %1233 = vperm.xlu1 %3055, %v1111_v8   ;;  %v1135_v63 = vrot.slane %v1109_v43, %v3396_v44  ;;  %v1139_v0 = vrot.slane %v1109_v43, %v3405_v49  ;;  %v1239_v1 = vrot.slane %v1108_v36, %v3402_v48  ;;  %v1243_v2 = vrot.slane %v1108_v36, %v3408_v50 }
  0x39   : > { %v1247_v3 = vrot.slane %v1109_v43, %v3402_v48  ;;  %v1251_v4 = vrot.slane %v1109_v43, %v3408_v50  ;;  %v1203_v8 = vrot.slane %v1183_v57, %v3390_v37 }
  0x3a   : > { %s2899_s1 = sshll.u32 %s3953_s21, 9 }
  0x3b   : > { %1297 = vperm.xlu0 %3053, %v1289_v11   ;;  %v1147_v11 = vrot.slane %v1127_v60, %v3396_v44 }
  0x3c   : > { %3056 = vset.pattern.permute.xlu1 %v3124_v7 }
  0x3d   : > { %827 = vperm.xlu1 %3056, %v821_v12  }
  0x3f   : > { %3060 = vset.pattern.permute.xlu0 %v3123_v6 }
  0x40   : > { %908 = vperm.xlu0 %3060, %v823_v13  }
  0x41   : > { %3057 = vset.pattern.permute.xlu1 %v3123_v6 }
  0x42   : > { %900 = vperm.xlu1 %3057, %v821_v12  }
  0x44   : > { %3061 = vset.pattern.permute.xlu0 %v3125_v10 }
  0x45   : > { %1229 = vperm.xlu0 %3061, %v1110_v5   ;;  %v3426_v5 = vadd.f32 %v817_v52, %v811_v51 }
  0x46   : > { %904 = vperm.xlu1 %3057, %v822_v9  }
  0x49   : > { %984 = vperm.xlu0 %3061, %v821_v12   ;;  %v1151_v12 = vrot.slane %v1131_v62, %v3396_v44 }
  0x4a   : > { %3058 = vset.pattern.permute.xlu1 %v3125_v10 }
  0x4b   : > { %988 = vperm.xlu1 %3058, %v822_v9   ;;  %v1207_v9 = vrot.slane %v1187_v58, %v3390_v37 }
  0x4d   : > { %996 = vperm.xlu0 %3061, %v824_v14  }
  0x4f   : > { %3059 = vset.pattern.permute.xlu1 %v3124_v7 }
  0x50   : > { %1292 = vperm.xlu1 %3059, %v1288_v15   ;;  %v1259_v15 = vrot.slane %v1239_v1, %v3402_v48 }
  0x51   : > { %3065 = vset.pattern.permute.xlu0 %v3124_v7 }
  0x52   : > { %1083 = vperm.xlu0 %3065, %v1069_v16  }
  0x54   : > { %837 = vperm.xlu1 %3059, %v823_v13  }
  0x56   : > { %1638 = vperm.xlu0 %3065, %v1634_v17  }
  0x58   : > { %842 = vperm.xlu1 %3059, %v824_v14  }
  0x5a   : > { %2290 = vperm.xlu0 %3065, %v2280_v18   ;;  %v1263_v18 = vrot.slane %v1243_v2, %v3402_v48 }
  0x5c   : > { %3062 = vset.pattern.permute.xlu1 %v3123_v6  ;;  %v1199_v6 = vrot.slane %v1179_v53, %v3390_v37 }
  0x5d   : > { %912 = vperm.xlu1 %3062, %v824_v14   ;;  %v1159_v14 = vrot.slane %v1139_v0, %v3396_v44 }
  0x5e   : > { %2300 = vperm.xlu0 %3065, %v2282_v19   ;;  %v1267_v19 = vrot.slane %v1247_v3, %v3402_v48 }
  0x61   : > { %3063 = vset.pattern.permute.xlu1 %v3125_v10  ;;  %v1211_v10 = vrot.slane %v1191_v59, %v3390_v37 }
  0x62   : > { %992 = vperm.xlu1 %3063, %v823_v13   ;;  %v1155_v13 = vrot.slane %v1135_v63, %v3396_v44 }
  0x66   : > { %3064 = vset.pattern.permute.xlu1 %v3124_v7  ;;  %v3429_v7 = vadd.f32 %v818_v55, %v812_v54 }
  0x67   : > { %1073 = vperm.xlu1 %3064, %v1067_v20   ;;  %v1271_v20 = vrot.slane %v1251_v4, %v3402_v48 }
  0x6b   : > { %1078 = vperm.xlu1 %3064, %v1068_v21   ;;  %v850_v21 = vrot.slane %v3426_v5, %v3396_v44 }
  0x6f   : > { %1088 = vperm.xlu1 %3064, %v1070_v22   ;;  %v854_v22 = vrot.slane %v3426_v5, %v3405_v49 }
  0x73   : > { %1643 = vperm.xlu1 %3064, %v1635_v24   ;;  %v858_v24 = vrot.slane %v3429_v7, %v3396_v44 }
  0x77   : > { %2285 = vperm.xlu1 %3064, %v2279_v25   ;;  %v918_v25 = vrot.slane %v3426_v5, %v3390_v37 }
  0x7b   : > { %2295 = vperm.xlu1 %3064, %v2281_v26   ;;  %v922_v26 = vrot.slane %v3426_v5, %v3399_v45 }
  0x7f   : > { %2323 = vperm.xlu1 %3064, %v2320_v27  }
  0xae   : > { %v3374_v28 = vpop.permute.xlu1 %1169  ;;  %v3376_v29 = vpop.permute.xlu0 %1114 }
  0xaf   : > { %v1212_v47 = vmul.f32 %v1199_v6, %v3374_v28  ;;  %v1213_v51 = vmul.f32 %v1203_v8, %v3374_v28  ;;  %v1214_v52 = vmul.f32 %v1207_v9, %v3374_v28  ;;  %v1215_v53 = vmul.f32 %v1211_v10, %v3374_v28 }
  0xb0   : > { %v1161_v59 = vmul.f32 %v1151_v12, %v3376_v29  ;;  %v1162_v60 = vmul.f32 %v1155_v13, %v3376_v29  ;;  %v1163_v62 = vmul.f32 %v1159_v14, %v3376_v29 }
  0xb2   : > { %v3378_v31 = vpop.permute.xlu1 %1173  ;;  %v3380_v32 = vpop.permute.xlu0 %1119  ;;  %v1221_v30 = vadd.f32 %v1213_v51, %v1161_v59 }
  0xb3   : > { %v1216_v27 = vmul.f32 %v1199_v6, %v3378_v31  ;;  %v1217_v34 = vmul.f32 %v1203_v8, %v3378_v31  ;;  %v1218_v36 = vmul.f32 %v1207_v9, %v3378_v31  ;;  %v1219_v39 = vmul.f32 %v1211_v10, %v3378_v31 }
  0xb4   : > { %v1164_v40 = vmul.f32 %v1147_v11, %v3380_v32  ;;  %v1165_v41 = vmul.f32 %v1151_v12, %v3380_v32  ;;  %v1166_v42 = vmul.f32 %v1155_v13, %v3380_v32  ;;  %v1167_v43 = vmul.f32 %v1159_v14, %v3380_v32 }
  0xb5   : > { %v1160_v32 = vmul.f32 %v1147_v11, %v3376_v29  ;;  %v1223_v12 = vadd.f32 %v1215_v53, %v1163_v62  ;;  %v1222_v13 = vadd.f32 %v1214_v52, %v1162_v60  ;;  %v862_v29 = vrot.slane %v3429_v7, %v3405_v49 }
  0xb6   : > { %v3387_v35 = vpop.permute.xlu0 %832  ;;  %v1225_v63 = vadd.f32 %v1217_v34, %v1165_v41  ;;  %v1227_v0 = vadd.f32 %v1219_v39, %v1167_v43  ;;  %v1224_v28 = vadd.f32 %v1216_v27, %v1164_v40  ;;  %v1226_v1 = vadd.f32 %v1218_v36, %v1166_v42 }
  0xb7   : > { %v3392_v38 = vpop.permute.xlu1 %1233  ;;  %v1220_v23 = vadd.f32 %v1212_v47, %v1160_v32  ;;  %v926_v14 = vrot.slane %v3429_v7, %v3390_v37  ;;  %v1014_v53 = vrot.slane %v3429_v7, %v3408_v50  ;;  %v3527_v32 = vrot.slane %v858_v24, %v3396_v44 }
  0xb8   : > { %v1276_v31 = vmul.f32 %v1259_v15, %v3392_v38  ;;  %v1277_v54 = vmul.f32 %v1263_v18, %v3392_v38  ;;  %v1278_v55 = vmul.f32 %v1267_v19, %v3392_v38  ;;  %v1279_v57 = vmul.f32 %v1271_v20, %v3392_v38 }
  0xb9   : > { %v3530_v59 = vrot.slane %v862_v29, %v3396_v44  ;;  %v3539_v49 = vrot.slane %v926_v14, %v3390_v37  ;;  %v889_v62 = vmul.f32 %v3527_v32, %v3387_v35 }
  0xba   : > { %v3411_v56 = vpop.permute.xlu0 %1297  ;;  %v1285_v38 = vadd.f32 %v1277_v54, %v1225_v63  ;;  %v1287_v9 = vadd.f32 %v1279_v57, %v1227_v0  ;;  %v1284_v10 = vadd.f32 %v1276_v31, %v1224_v28  ;;  %v1286_v11 = vadd.f32 %v1278_v55, %v1226_v1 }
  0xbb   : > { %v3513_v57 = vrot.slane %v850_v21, %v3396_v44  ;;  %v3536_v21 = vrot.slane %v922_v26, %v3390_v37  ;;  %v3564_v26 = vrot.slane %v1014_v53, %v3402_v48  ;;  %v890_v63 = vmul.f32 %v3530_v59, %v3387_v35 }
  0xbc   : > { %v3417_v61 = vpop.permute.xlu1 %827  ;;  %v1305_v39 = vadd.f32 %v3411_v56, %v1285_v38  ;;  %v1307_v40 = vadd.f32 %v3411_v56, %v1287_v9  ;;  %v1304_v41 = vadd.f32 %v3411_v56, %v1284_v10  ;;  %v1306_v42 = vadd.f32 %v3411_v56, %v1286_v11 }
  0xbd   : > { %v883_v0 = vmul.f32 %v3513_v57, %v3417_v61  ;;  %v885_v1 = vmul.f32 %v3527_v32, %v3417_v61  ;;  %v3947_v9 = vmov 0.0  }
  0xbf   : > { %v3439_v16 = vpop.permute.xlu0 %908 }
  0xc0   : > { %v960_v10 = vmul.f32 %v3536_v21, %v3439_v16  ;;  %v961_v11 = vmul.f32 %v3539_v49, %v3439_v16 }
  0xc1   : > { %v3441_v17 = vpop.permute.xlu1 %900 }
  0xc4   : > { %v1230_v58 = vpop.permute.xlu0 %1229 }
  0xc5   : > { %v3464_v46 = vpop.permute.xlu1 %904  ;;  %v1272_v2 = vmul.f32 %v1259_v15, %v1230_v58  ;;  %v1273_v3 = vmul.f32 %v1263_v18, %v1230_v58  ;;  %v1274_v4 = vmul.f32 %v1267_v19, %v1230_v58  ;;  %v1275_v6 = vmul.f32 %v1271_v20, %v1230_v58 }
  0xc6   : > { %v930_v15 = vrot.slane %v3429_v7, %v3399_v45  ;;  %v3487_v18 = vrot.slane %v918_v25, %v3390_v37  ;;  %v1002_v25 = vrot.slane %v3426_v5, %v3402_v48  ;;  %v3519_v58 = vrot.slane %v854_v22, %v3396_v44  ;;  %v1310_v45 = vld [vmem:[%s3946_s27] sm:$0xff] }
  0xc7   : > { %v1281_v19 = vadd.f32 %v1273_v3, %v1221_v30  ;;  %v1283_v20 = vadd.f32 %v1275_v6, %v1223_v12  ;;  %v1280_v27 = vadd.f32 %v1272_v2, %v1220_v23  ;;  %v1282_v34 = vadd.f32 %v1274_v4, %v1222_v13 }
  0xc8   : > { %v1006_v23 = vrot.slane %v3426_v5, %v3408_v50  ;;  %v1010_v30 = vrot.slane %v3429_v7, %v3402_v48  ;;  %v3543_v22 = vrot.slane %v930_v15, %v3390_v37  ;;  %v3546_v7 = vrot.slane %v1002_v25, %v3402_v48  ;;  %v985_v38 = vpop.permute.xlu0 %984 }
  0xc9   : > { %v887_v5 = vmul.f32 %v3513_v57, %v3387_v35  ;;  %v951_v37 = vmul.f32 %v3487_v18, %v3441_v17  ;;  %v888_v60 = vmul.f32 %v3519_v58, %v3387_v35  ;;  %v886_v2 = vmul.f32 %v3530_v59, %v3417_v61 }
  0xca   : > { %v3478_v8 = vpop.permute.xlu1 %988  ;;  %v3549_v44 = vrot.slane %v1006_v23, %v3402_v48  ;;  %v3561_v24 = vrot.slane %v1010_v30, %v3402_v48  ;;  %v884_v48 = vmul.f32 %v3519_v58, %v3417_v61  ;;  %v3585_v3 = vmul.f32 %v3487_v18, %v3439_v16  ;;  %v1311_v61 = vld [vmem:[%s3946_s27 + $0x8] sm:$0xff] }
  0xcb   : > { %v952_v35 = vmul.f32 %v3536_v21, %v3441_v17  ;;  %v953_v4 = vmul.f32 %v3539_v49, %v3441_v17  ;;  %v954_v6 = vmul.f32 %v3543_v22, %v3441_v17  ;;  %v962_v12 = vmul.f32 %v3543_v22, %v3439_v16 }
  0xcc   : > { %v967_v13 = vadd.f32 %v951_v37, %v883_v0  ;;  %v955_v17 = vmul.f32 %v3487_v18, %v3464_v46  ;;  %v956_v29 = vmul.f32 %v3536_v21, %v3464_v46  ;;  %v957_v14 = vmul.f32 %v3539_v49, %v3464_v46 }
  0xcd   : > { %v958_v15 = vmul.f32 %v3543_v22, %v3464_v46  ;;  %v1037_v16 = vmul.f32 %v3561_v24, %v985_v38  ;;  %v1040_v46 = vmul.f32 %v3549_v44, %v3478_v8 }
  0xce   : > { %v973_v25 = vadd.f32 %v957_v14, %v889_v62 }
  0xcf   : > { %v1293_v36 = vpop.permute.xlu1 %1292  ;;  %v974_v23 = vadd.f32 %v958_v15, %v890_v63 }
  0xd0   : > { %v1301_v43 = vadd.f32 %v1293_v36, %v1281_v19  ;;  %v1303_v47 = vadd.f32 %v1293_v36, %v1283_v20  ;;  %v1300_v51 = vadd.f32 %v1293_v36, %v1280_v27  ;;  %v1302_v52 = vadd.f32 %v1293_v36, %v1282_v34 }
  0xd1   : > { %v1035_v19 = vmul.f32 %v3546_v7, %v985_v38  ;;  %v1036_v20 = vmul.f32 %v3549_v44, %v985_v38  ;;  %v1038_v27 = vmul.f32 %v3564_v26, %v985_v38  ;;  %v968_v36 = vadd.f32 %v952_v35, %v884_v48 }
  0xd2   : > { %v3501_v31 = vpack.c.bf16 %v1305_v39, %v1301_v43  ;;  %v3503_v54 = vpack.c.bf16 %v1307_v40, %v1303_v47  ;;  %v3505_v56 = vpack.c.bf16 %v1304_v41, %v1300_v51  ;;  %v3507_v55 = vpack.c.bf16 %v1306_v42, %v1302_v52  ;;  %v997_v47 = vpop.permute.xlu0 %996 }
  0xd3   : > { %v3521_v50 = vpop.permute.xlu1 %837  ;;  %v969_v39 = vadd.f32 %v953_v4, %v885_v1  ;;  %v970_v40 = vadd.f32 %v954_v6, %v886_v2  ;;  %v1039_v41 = vmul.f32 %v3546_v7, %v3478_v8  ;;  %v1041_v42 = vmul.f32 %v3561_v24, %v3478_v8 }
  0xd4   : > { %2904 = vmatprep.subr.bf16.mxu0 %v3501_v31  ;;  %2908 = vmatprep.subr.bf16.mxu1 %v3503_v54  ;;  %v1042_v43 = vmul.f32 %v3564_v26, %v3478_v8  ;;  %v971_v51 = vadd.f32 %v955_v17, %v887_v5  ;;  %v972_v52 = vadd.f32 %v956_v29, %v888_v60 }
  0xd5   : > { %2906 = vmatpush1.bf16.msra.mxu0 %v3505_v56  ;;  %2910 = vmatpush1.bf16.msra.mxu1 %v3507_v55  ;;  %v1051_v30 = vadd.f32 %v1035_v19, %v967_v13  ;;  %v1052_v53 = vadd.f32 %v1036_v20, %v968_v36  ;;  %v1054_v37 = vadd.f32 %v1038_v27, %v970_v40 }
  0xd6   : > { %v1047_v0 = vmul.f32 %v3546_v7, %v997_v47  ;;  %v1048_v48 = vmul.f32 %v3549_v44, %v997_v47  ;;  %v1049_v1 = vmul.f32 %v3561_v24, %v997_v47  ;;  %v1050_v8 = vmul.f32 %v3564_v26, %v997_v47 }
  0xd7   : > { %v3575_v28 = vpop.permute.xlu1 %842  ;;  %v1055_v35 = vadd.f32 %v1039_v41, %v971_v51  ;;  %v1056_v4 = vadd.f32 %v1040_v46, %v972_v52  ;;  %v1057_v6 = vadd.f32 %v1041_v42, %v973_v25  ;;  %v1058_v5 = vadd.f32 %v1042_v43, %v974_v23  ;;  %v1084_v52 = vpop.permute.xlu0 %1083 }
  0xd8   : > { %2865 = vmatmul.mubr.msk.f32.vlgmr.msra.gmra.mrb[0].mxu0 %vm1312_vm1, %v1310_v45  ;;  %2867 = vmatmul.mubr.msk.f32.vlgmr.msra.gmra.mrb[0].mxu1 %vm1312_vm1, %v1310_v45  ;;  %v1053_v45 = vadd.f32 %v1037_v16, %v969_v39  ;;  %v891_v60 = vmul.f32 %v3513_v57, %v3521_v50  ;;  %v892_v62 = vmul.f32 %v3519_v58, %v3521_v50 }
  0xd9   : > { %1389 = vmatprep.mubr.f32.mxu0 %v3947_v9  ;;  %1466 = vmatprep.mubr.f32.mxu1 %v3947_v9  ;;  %v893_v63 = vmul.f32 %v3527_v32, %v3521_v50  ;;  %v894_v38 = vmul.f32 %v3530_v59, %v3521_v50  ;;  %v895_v16 = vmul.f32 %v3513_v57, %v3575_v28 }
  0xda   : > { %v897_v50 = vmul.f32 %v3527_v32, %v3575_v28 }
  0xdc   : > { %v913_v34 = vpop.permute.xlu1 %912  ;;  %2866 = vmatmul.mubr.msk.f32.gmra.mrb[2].mxu0 %vm1312_vm1, %v1311_v61  ;;  %2868 = vmatmul.mubr.msk.f32.gmra.mrb[2].mxu1 %vm1312_vm1, %v1311_v61 }
  0xdd   : > { %1544 = vmatprep.mubr.f32.mxu0 %v3947_v9  ;;  %1621 = vmatprep.mubr.f32.mxu1 %v3947_v9  ;;  %v963_v61 = vmul.f32 %v3487_v18, %v913_v34  ;;  %v964_v13 = vmul.f32 %v3536_v21, %v913_v34  ;;  %v965_v17 = vmul.f32 %v3539_v49, %v913_v34 }
  0xde   : > { %v966_v29 = vmul.f32 %v3543_v22, %v913_v34  ;;  %v896_v18 = vmul.f32 %v3519_v58, %v3575_v28  ;;  %v898_v21 = vmul.f32 %v3530_v59, %v3575_v28  ;;  %v975_v22 = vadd.f32 %v3585_v3, %v891_v60 }
  0xdf   : > { %v979_v27 = vadd.f32 %v963_v61, %v895_v16  ;;  %v981_v34 = vadd.f32 %v965_v17, %v897_v50  ;;  %v1680_v61 = vld [vmem:[%s3952_s0] sm:$0xff]  ;;  %v1682_v17 = vld [vmem:[%s3952_s0 + $0x10] sm:$0xff] }
  0xe0   : > { %v982_v36 = vadd.f32 %v966_v29, %v898_v21  ;;  %v1683_v29 = vld [vmem:[%s3952_s0 + $0x18] sm:$0xff] }
  0xe1   : > { %v993_v2 = vpop.permute.xlu1 %992 }
  0xe2   : > { %v1043_v14 = vmul.f32 %v3546_v7, %v993_v2  ;;  %v1044_v15 = vmul.f32 %v3549_v44, %v993_v2  ;;  %v1045_v19 = vmul.f32 %v3561_v24, %v993_v2  ;;  %v1046_v20 = vmul.f32 %v3564_v26, %v993_v2 }
  0xe3   : > { %v976_v7 = vadd.f32 %v960_v10, %v892_v62  ;;  %v977_v44 = vadd.f32 %v961_v11, %v893_v63  ;;  %v978_v24 = vadd.f32 %v962_v12, %v894_v38  ;;  %v980_v26 = vadd.f32 %v964_v13, %v896_v18  ;;  %v1681_v13 = vld [vmem:[%s3952_s0 + $0x8] sm:$0xff] }
  0xe4   : > { %v1059_v57 = vadd.f32 %v1043_v14, %v975_v22  ;;  %v1063_v10 = vadd.f32 %v1047_v0, %v979_v27  ;;  %v1065_v12 = vadd.f32 %v1049_v1, %v981_v34  ;;  %v1066_v51 = vadd.f32 %v1050_v8, %v982_v36  ;;  %v1639_v14 = vpop.permute.xlu0 %1638 }
  0xe5   : > { %v1060_v39 = vadd.f32 %v1044_v15, %v976_v7  ;;  %v1061_v40 = vadd.f32 %v1045_v19, %v977_v44  ;;  %v1062_v58 = vadd.f32 %v1046_v20, %v978_v24  ;;  %v1064_v11 = vadd.f32 %v1048_v48, %v980_v26 }
  0xe6   : > { %v1074_v49 = vpop.permute.xlu1 %1073  ;;  %v1099_v62 = vadd.f32 %v1084_v52, %v1059_v57 }
  0xe7   : > { %v1091_v41 = vadd.f32 %v1074_v49, %v1051_v30  ;;  %v1092_v46 = vadd.f32 %v1074_v49, %v1052_v53  ;;  %v1093_v32 = vadd.f32 %v1074_v49, %v1053_v45  ;;  %v1094_v42 = vadd.f32 %v1074_v49, %v1054_v37 }
  0xe8   : > { %v1100_v63 = vadd.f32 %v1084_v52, %v1060_v39  ;;  %v1101_v30 = vadd.f32 %v1084_v52, %v1061_v40  ;;  %v1102_v53 = vadd.f32 %v1084_v52, %v1062_v58 }
  0xea   : > { %v1079_v43 = vpop.permute.xlu1 %1078 }
  0xeb   : > { %v1095_v59 = vadd.f32 %v1079_v43, %v1055_v35  ;;  %v1096_v28 = vadd.f32 %v1079_v43, %v1056_v4  ;;  %v1097_v47 = vadd.f32 %v1079_v43, %v1057_v6  ;;  %v1098_v3 = vadd.f32 %v1079_v43, %v1058_v5  ;;  %v1308_v6 = vld [vmem:[%s3948_s26] sm:$0xff]  ;;  %v1309_v5 = vld [vmem:[%s3949_s23 + $0x8] sm:$0xff] }
  0xed   : > { %v2911_v25 = vpack.c.bf16 %v1096_v28, %v1092_v46  ;;  %v2919_v23 = vpack.c.bf16 %v1098_v3, %v1094_v42  ;;  %v2913_v2 = vpack.c.bf16 %v1095_v59, %v1091_v41  ;;  %v2921_v60 = vpack.c.bf16 %v1097_v47, %v1093_v32 }
  0xee   : > { %v1089_v45 = vpop.permute.xlu1 %1088 }
  0xef   : > { %v1103_v37 = vadd.f32 %v1089_v45, %v1063_v10  ;;  %v1104_v38 = vadd.f32 %v1089_v45, %v1064_v11  ;;  %v1105_v35 = vadd.f32 %v1089_v45, %v1065_v12  ;;  %v1106_v4 = vadd.f32 %v1089_v45, %v1066_v51  ;;  %2912 = vmatprep.subr.bf16.mxu0 %v2911_v25  ;;  %v1667_v45 = vld [vmem:[%s3309_s13 + $0x8] sm:$0xff] }
  0xf0   : > { %2920 = vmatprep.subr.bf16.mxu1 %v2919_v23  ;;  %2914 = vmatpush1.bf16.msra.mxu0 %v2913_v2 }
  0xf1   : > { %2922 = vmatpush1.bf16.msra.mxu1 %v2921_v60  ;;  %v2915_v0 = vpack.c.bf16 %v1104_v38, %v1100_v63  ;;  %v2923_v48 = vpack.c.bf16 %v1106_v4, %v1102_v53  ;;  %v2917_v1 = vpack.c.bf16 %v1103_v37, %v1099_v62  ;;  %v2925_v8 = vpack.c.bf16 %v1105_v35, %v1101_v30  ;;  %v1666_v53 = vld [vmem:[%s3309_s13] sm:$0xff] }
  0xf2   : > { %v1644_v49 = vpop.permute.xlu1 %1643  ;;  %v1668_v37 = vunpack.c.l.bf16 %v1666_v53  ;;  %v1670_v35 = vunpack.c.l.bf16 %v1667_v45 }
  0xf3   : > { %2916 = vmatprep.subr.bf16.mxu0 %v2915_v0  ;;  %2924 = vmatprep.subr.bf16.mxu1 %v2923_v48 }
  0xf4   : > { %2918 = vmatpush1.bf16.msra.mxu0 %v2917_v1 }
  0xf5   : > { %2926 = vmatpush1.bf16.msra.mxu1 %v2925_v8  ;;  %2928 = vmatprep.subr.bf16.mxu0 %v3501_v31  ;;  %v1684_v31 = vld [vmem:[%s3950_s3] sm:$0xff] }
  0xf6   : > { %2932 = vmatprep.subr.bf16.mxu1 %v3503_v54  ;;  %v1685_v54 = vld [vmem:[%s3951_s4 + $0x8] sm:$0xff] }
  0xf7   : > { %2869 = vmatmul.mubr.msk.f32.vlgmr.msra.gmra.mrb[0].mxu0 %vm1473_vm2, %v1308_v6 }
  0xf8   : > { %2871 = vmatmul.mubr.msk.f32.vlgmr.msra.gmra.mrb[0].mxu1 %vm1473_vm2, %v1308_v6  ;;  %2930 = vmatpush1.bf16.msra.mxu0 %v3505_v56  ;;  %v1686_v56 = vld [vmem:[%s3951_s4 + $0x10] sm:$0xff] }
  0xf9   : > { %2934 = vmatpush1.bf16.msra.mxu1 %v3507_v55  ;;  %2936 = vmatprep.subr.bf16.mxu0 %v2911_v25  ;;  %v1687_v55 = vld [vmem:[%s3951_s4 + $0x18] sm:$0xff] }
  0xfa   : > { %2944 = vmatprep.subr.bf16.mxu1 %v2919_v23  ;;  %1550 = vmatprep.mubr.f32.mxu0 %v3947_v9 }
  0xfb   : > { %1627 = vmatprep.mubr.f32.mxu1 %v3947_v9  ;;  %2870 = vmatmul.mubr.msk.f32.gmra.mrb[2].mxu0 %vm1473_vm2, %v1309_v5 }
  0xfc   : > { %2872 = vmatmul.mubr.msk.f32.gmra.mrb[2].mxu1 %vm1473_vm2, %v1309_v5  ;;  %1764 = vmatprep.mubr.f32.mxu0 %v3947_v9 }
  0xfd   : > { %1853 = vmatprep.mubr.f32.mxu1 %v3947_v9 }
  0xff   : > { %2873 = vmatmul.mubr.msk.f32.vlgmr.msra.gmra.mrb[4].mxu0 %vm1312_vm1, %v1684_v31 }
 0x100   : > { %2877 = vmatmul.mubr.msk.f32.vlgmr.msra.gmra.mrb[4].mxu1 %vm1312_vm1, %v1684_v31  ;;  %2938 = vmatpush1.bf16.msra.mxu0 %v2913_v2  ;;  %v1671_v31 = vunpack.c.h.bf16 %v1667_v45 }
 0x101   : > { %2946 = vmatpush1.bf16.msra.mxu1 %v2921_v60  ;;  %2940 = vmatprep.subr.bf16.mxu0 %v2915_v0 }
 0x102   : > { %2948 = vmatprep.subr.bf16.mxu1 %v2923_v48  ;;  %1770 = vmatprep.mubr.f32.mxu0 %v3947_v9  ;;  %v1669_v48 = vunpack.c.h.bf16 %v1666_v53  ;;  %v2070_v53 = vld [vmem:[%s3955_s30 + $0x10] sm:$0xff] }
 0x103   : > { %1859 = vmatprep.mubr.f32.mxu1 %v3947_v9  ;;  %2874 = vmatmul.mubr.msk.f32.gmra.mrb[6].mxu0 %vm1312_vm1, %v1685_v54 }
 0x104   : > { %2942 = vmatpush1.bf16.msra.mxu0 %v2917_v1  ;;  %2878 = vmatmul.mubr.msk.f32.gmra.mrb[6].mxu1 %vm1312_vm1, %v1685_v54 }
 0x105   : > { %2950 = vmatpush1.bf16.msra.mxu1 %v2925_v8  ;;  %1776 = vmatprep.mubr.f32.mxu0 %v3947_v9 }
 0x106   : > { %1865 = vmatprep.mubr.f32.mxu1 %v3947_v9 }
 0x107   : > { %2875 = vmatmul.mubr.msk.f32.gmra.mrb[8].mxu0 %vm1312_vm1, %v1686_v56 }
 0x108   : > { %2879 = vmatmul.mubr.msk.f32.gmra.mrb[8].mxu1 %vm1312_vm1, %v1686_v56  ;;  %1782 = vmatprep.mubr.f32.mxu0 %v3947_v9 }
 0x109   : > { %1871 = vmatprep.mubr.f32.mxu1 %v3947_v9 }
 0x10b   : > { %2876 = vmatmul.mubr.msk.f32.gmra.mrb[10].mxu0 %vm1312_vm1, %v1687_v55 }
 0x10c   : > { %2880 = vmatmul.mubr.msk.f32.gmra.mrb[10].mxu1 %vm1312_vm1, %v1687_v55  ;;  %1954 = vmatprep.mubr.f32.mxu0 %v3947_v9 }
 0x10d   : > { %2043 = vmatprep.mubr.f32.mxu1 %v3947_v9 }
 0x10f   : > { %2881 = vmatmul.mubr.msk.f32.vlgmr.msra.gmra.mrb[4].mxu0 %vm1473_vm2, %v1680_v61 }
 0x110   : > { %2885 = vmatmul.mubr.msk.f32.vlgmr.msra.gmra.mrb[4].mxu1 %vm1473_vm2, %v1680_v61  ;;  %1960 = vmatprep.mubr.f32.mxu0 %v3947_v9 }
 0x111   : > { %2049 = vmatprep.mubr.f32.mxu1 %v3947_v9 }
 0x113   : > { %2882 = vmatmul.mubr.msk.f32.gmra.mrb[6].mxu0 %vm1473_vm2, %v1681_v13 }
 0x114   : > { %2886 = vmatmul.mubr.msk.f32.gmra.mrb[6].mxu1 %vm1473_vm2, %v1681_v13  ;;  %1966 = vmatprep.mubr.f32.mxu0 %v3947_v9 }
 0x115   : > { %2055 = vmatprep.mubr.f32.mxu1 %v3947_v9 }
 0x117   : > { %2883 = vmatmul.mubr.msk.f32.gmra.mrb[8].mxu0 %vm1473_vm2, %v1682_v17 }
 0x118   : > { %2887 = vmatmul.mubr.msk.f32.gmra.mrb[8].mxu1 %vm1473_vm2, %v1682_v17  ;;  %1972 = vmatprep.mubr.f32.mxu0 %v3947_v9 }
 0x119   : > { %2061 = vmatprep.mubr.f32.mxu1 %v3947_v9 }
 0x11b   : > { %2884 = vmatmul.mubr.msk.f32.gmra.mrb[10].mxu0 %vm1473_vm2, %v1683_v29 }
 0x11c   : > { %2888 = vmatmul.mubr.msk.f32.gmra.mrb[10].mxu1 %vm1473_vm2, %v1683_v29  ;;  %2149 = vmatprep.mubr.f32.mxu0 %v3947_v9 }
 0x11d   : > { %2238 = vmatprep.mubr.f32.mxu1 %v3947_v9 }
 0x1ca   : > { %v1546_v15 = vpop.f32.mrb[0].mxu0 }
 0x1cb   : > { %v3733_v19 = vadd.f32 %v1639_v14, %v1546_v15  ;;  %v1623_v20 = vpop.f32.mrb[0].mxu1  ;;  %v1548_v16 = vpop.f32.mrb[1].mxu0  ;;  %v3954_v15 = vlaneseq }
 0x1cc   : > { %v3735_v18 = vadd.f32 %v1639_v14, %v1623_v20  ;;  %v3737_v50 = vadd.f32 %v1639_v14, %v1548_v16  ;;  %v1625_v21 = vpop.f32.mrb[1].mxu1 }
 0x1cd   : > { %v2521_v7 = vmul.f32 %v3733_v19, %v3733_v19  ;;  %v3741_v44 = vadd.f32 %v1639_v14, %v1625_v21  ;;  %v2566_v20 = vand.u32 127, %v3954_v15  ;;  %vm3813_vm8 = vcmp.lt.s32.totalorder %v3954_v15, 512 }
 0x1ce   : > { %v1552_v22 = vpop.f32.mrb[2].mxu0  ;;  %v2523_v34 = vmul.f32 %v3735_v18, %v3735_v18  ;;  %v2522_v36 = vmul.f32 %v3737_v50, %v3737_v50 }
 0x1cf   : > { %v1650_v24 = vadd.f32 %v1644_v49, %v1552_v22  ;;  %v1629_v27 = vpop.f32.mrb[2].mxu1  ;;  %v1554_v26 = vpop.f32.mrb[3].mxu0  ;;  %v2524_v2 = vmul.f32 %v3741_v44, %v3741_v44 }
 0x1d0   : > { %v1652_v57 = vadd.f32 %v1644_v49, %v1629_v27  ;;  %v1651_v39 = vadd.f32 %v1644_v49, %v1554_v26  ;;  %v1631_v40 = vpop.f32.mrb[3].mxu1 }
 0x1d1   : > { %v1654_v58 = vmul.f32 0.5, %v1650_v24  ;;  %v2517_v41 = vadd.f32 1.0, %v1650_v24  ;;  %v2529_v46 = vmul.f32 1.442695, %v1650_v24  ;;  %v1653_v32 = vadd.f32 %v1644_v49, %v1631_v40 }
 0x1d2   : > { %v1656_v42 = vmul.f32 0.5, %v1652_v57  ;;  %v2519_v43 = vadd.f32 1.0, %v1652_v57  ;;  %v2533_v59 = vmul.f32 1.442695, %v1652_v57  ;;  %v1655_v28 = vmul.f32 0.5, %v1651_v39 }
 0x1d3   : > { %v1658_v47 = vmul.f32 1.442695, %v1654_v58  ;;  %v2525_v3 = vsub.f32 %v2517_v41, %v2521_v7  ;;  %3066 = vpow2.f32 %v2529_v46  ;;  %v2518_v10 = vadd.f32 1.0, %v1651_v39 }
 0x1d4   : > { %v1662_v11 = vmul.f32 1.442695, %v1656_v42  ;;  %v2527_v12 = vsub.f32 %v2519_v43, %v2523_v34  ;;  %3068 = vpow2.f32 %v2533_v59  ;;  %v1660_v51 = vmul.f32 1.442695, %v1655_v28 }
 0x1d5   : > { %3070 = vpow2.f32 %v1658_v47  ;;  %v2526_v52 = vsub.f32 %v2518_v10, %v2522_v36  ;;  %v2531_v25 = vmul.f32 1.442695, %v1651_v39  ;;  %v1657_v23 = vmul.f32 0.5, %v1653_v32 }
 0x1d6   : > { %3072 = vpow2.f32 %v1662_v11  ;;  %v2520_v60 = vadd.f32 1.0, %v1653_v32  ;;  %v2535_v62 = vmul.f32 1.442695, %v1653_v32  ;;  %v2571_v34 = vstv %s2899_s1 }
 0x1d7   : > { %3074 = vpow2.f32 %v1660_v51  ;;  %v1664_v63 = vmul.f32 1.442695, %v1657_v23  ;;  %v2568_v41 = vadd.s32 256, %v2566_v20  ;;  %v3761_v43 = vadd.s32 %v2571_v34, %v2566_v20 }
 0x1d8   : > { %3076 = vpow2.f32 %v2531_v25  ;;  %v2528_v30 = vsub.f32 %v2520_v60, %v2524_v2  ;;  %v3127_v59 = vmov 1966171168   ;;  %v2569_v47 = vadd.s32 384, %v2566_v20 }
 0x1d9   : > { %3078 = vpow2.f32 %v1664_v63  ;;  %v2596_v28 = vunpack.c.l.s4 %v3127_v59  ;;  %vm2576_vm4 = vcmp.lt.s32.totalorder %v3761_v43, 768  ;;  %v2588_v43 = vld [vmem:[%s3278_s22] sm:$0xf] }
 0x1da   : > { %3080 = vpow2.f32 %v2535_v62  ;;  %v3775_v60 = vadd.s32 %v2571_v34, %v2569_v47 }
 0x1db   : > { %v2597_v2 = vunpack.c.0.s8 %v2596_v28 }
 0x1dc   : > { %vm2579_vm7 = vcmp.lt.s32.totalorder %v3775_v60, 768 }
 0x1dd   : > { %v3067_v38 = vpop.eup %3066 }
 0x1de   : > { %v3069_v4 = vpop.eup %3068  ;;  %v2537_v0 = vsub.f32 %v2525_v3, %v3067_v38 }
 0x1df   : > { %v3071_v1 = vpop.eup %3070  ;;  %v2539_v8 = vsub.f32 %v2527_v12, %v3069_v4  ;;  %v3768_v12 = vadd.s32 %v2571_v34, %v2568_v41 }
 0x1e0   : > { %v3073_v6 = vpop.eup %3072  ;;  %v2541_v5 = vrot.slane %v2537_v0, 4  ;;  %v1672_v54 = vmul.f32 %v3071_v1, %v1668_v37 }
 0x1e1   : > { %v3075_v56 = vpop.eup %3074  ;;  %v2553_v55 = vrot.slane %v2539_v8, 4  ;;  %v1674_v61 = vmul.f32 %v3073_v6, %v1670_v35  ;;  %vm2578_vm5 = vcmp.lt.s32.totalorder %v3768_v12, 768  ;;  %v3789_v35 = vsub.s32 %v2597_v2, %v3383_v33 }
 0x1e2   : > { %v3077_v13 = vpop.eup %3076  ;;  %v2542_v17 = vadd.f32 %v2541_v5, %v2537_v0  ;;  %v1673_v29 = vmul.f32 %v3075_v56, %v1669_v48  ;;  %v1676_v14 = vadd.f32 %v1672_v54, %v3733_v19  ;;  %v2068_v19 = vld [vmem:[%s3955_s30] sm:$0xff]  ;;  %v2071_v0 = vld [vmem:[%s3955_s30 + $0x18] sm:$0xff] }
 0x1e3   : > { %v3079_v16 = vpop.eup %3078  ;;  %v2554_v21 = vadd.f32 %v2553_v55, %v2539_v8  ;;  %v2538_v49 = vsub.f32 %v2526_v52, %v3077_v13  ;;  %v1678_v22 = vadd.f32 %v1674_v61, %v3735_v18  ;;  %v2567_v18 = vadd.s32 128, %v2566_v20  ;;  %v2624_v56 = vld [vmem:[%s3286_s2] sm:$0xf]  ;;  %v2291_v20 = vpop.permute.xlu0 %2290 }
 0x1e4   : > { %v3081_v7 = vpop.eup %3080  ;;  %v2543_v24 = vrot.slane %v2542_v17, 2  ;;  %v1677_v27 = vadd.f32 %v1673_v29, %v3737_v50  ;;  %v1675_v26 = vmul.f32 %v3079_v16, %v1671_v31 }
 0x1e5   : > { %v2555_v36 = vrot.slane %v2554_v21, 2  ;;  %v2547_v57 = vrot.slane %v2538_v49, 4  ;;  %v2540_v39 = vsub.f32 %v2528_v30, %v3081_v7  ;;  %v3770_v51 = vadd.s32 %v2571_v34, %v2567_v18 }
 0x1e6   : > { %v2544_v40 = vadd.f32 %v2543_v24, %v2542_v17  ;;  %2085 = vmatprep.subr.mxu0 %v1677_v27  ;;  %v1679_v58 = vadd.f32 %v1675_v26, %v3741_v44  ;;  %v2069_v44 = vld [vmem:[%s3955_s30 + $0x8] sm:$0xff] }
 0x1e7   : > { %v2556_v46 = vadd.f32 %v2555_v36, %v2554_v21  ;;  %v2548_v32 = vadd.f32 %v2547_v57, %v2538_v49  ;;  %v2559_v42 = vrot.slane %v2540_v39, 4  ;;  %2086 = vmatpush1.msra.mxu0 %v1676_v14  ;;  %vm2577_vm6 = vcmp.lt.s32.totalorder %v3770_v51, 768  ;;  %v2286_v21 = vpop.permute.xlu1 %2285 }
 0x1e8   : > { %v2545_v50 = vrot.slane %v2544_v40, 1  ;;  %2174 = vmatprep.subr.mxu1 %v1679_v58  ;;  %2889 = vmatmul.mubr.msk.f32.vlgmr.msra.gmra.mrb[4].mxu0 %vm2072_vm3, %v2068_v19 }
 0x1e9   : > { %v2557_v3 = vrot.slane %v2556_v46, 1  ;;  %v2549_v10 = vrot.slane %v2548_v32, 2  ;;  %v2560_v11 = vadd.f32 %v2559_v42, %v2540_v39  ;;  %2175 = vmatpush1.msra.mxu1 %v1678_v22  ;;  %2155 = vmatprep.mubr.f32.mxu0 %v3947_v9  ;;  %v2301_v42 = vpop.permute.xlu0 %2300 }
 0x1ea   : > { %2893 = vmatmul.mubr.msk.f32.vlgmr.msra.gmra.mrb[4].mxu1 %vm2072_vm3, %v2068_v19  ;;  %v2546_v52 = vadd.f32 %v2545_v50, %v2544_v40 }
 0x1eb   : > { %v2550_v25 = vadd.f32 %v2549_v10, %v2548_v32  ;;  %v2561_v23 = vrot.slane %v2560_v11, 2  ;;  %2244 = vmatprep.mubr.f32.mxu1 %v3947_v9  ;;  %v2558_v62 = vadd.f32 %v2557_v3, %v2556_v46  ;;  %v2296_v59 = vpop.permute.xlu1 %2295 }
 0x1ec   : > { %2890 = vmatmul.mubr.msk.f32.gmra.mrb[6].mxu0 %vm2072_vm3, %v2069_v44  ;;  %v2584_v38 = vsel %vm2576_vm4, %v2546_v52, 0.0 }
 0x1ed   : > { %v2551_v63 = vrot.slane %v2550_v25, 1  ;;  %v2562_v30 = vadd.f32 %v2561_v23, %v2560_v11  ;;  %2161 = vmatprep.mubr.f32.mxu0 %v3947_v9  ;;  %v2586_v48 = vsel %vm2578_vm5, %v2558_v62, 0.0 }
 0x1ee   : > { %2894 = vmatmul.mubr.msk.f32.gmra.mrb[6].mxu1 %vm2072_vm3, %v2069_v44 }
 0x1ef   : > { %v2552_v45 = vadd.f32 %v2551_v63, %v2550_v25  ;;  %v2563_v37 = vrot.slane %v2562_v30, 1  ;;  %2250 = vmatprep.mubr.f32.mxu1 %v3947_v9 }
 0x1f0   : > { %2891 = vmatmul.mubr.msk.f32.gmra.mrb[8].mxu0 %vm2072_vm3, %v2070_v53 }
 0x1f1   : > { %v2564_v4 = vadd.f32 %v2563_v37, %v2562_v30  ;;  %2167 = vmatprep.mubr.f32.mxu0 %v3947_v9  ;;  %v2585_v1 = vsel %vm2577_vm6, %v2552_v45, 0.0 }
 0x1f2   : > { %2895 = vmatmul.mubr.msk.f32.gmra.mrb[8].mxu1 %vm2072_vm3, %v2070_v53  ;;  %v2629_v33 = vcombine.low %v2584_v38, %v2585_v1  ;;  %v2319_v38 = vld [vmem:[%s3958_s18] sm:$0x7]  ;;  %v2324_v1 = vpop.permute.xlu1 %2323 }
 0x1f3   : > { %2256 = vmatprep.mubr.f32.mxu1 %v3947_v9  ;;  %v2587_v8 = vsel %vm2579_vm7, %v2564_v4, 0.0  ;;  %v2471_v4 = vld [vmem:[%s3296_s17] sm:$0xff] }
 0x1f4   : > { %2892 = vmatmul.mubr.msk.f32.gmra.mrb[10].mxu0 %vm2072_vm3, %v2071_v0  ;;  %v2637_v6 = vrot.slane %v2629_v33, %v3789_v35  ;;  %v2630_v5 = vcombine.low %v2586_v48, %v2587_v8  ;;  %v3828_v48 = vunpack.c.h.bf16 %v2471_v4 }
 0x1f5   : > { %2393 = vmatprep.mubr.f32.mxu0 %v3947_v9 }
 0x1f6   : > { %2896 = vmatmul.mubr.msk.f32.gmra.mrb[10].mxu1 %vm2072_vm3, %v2071_v0  ;;  %v2644_v31 = vrot.slane %v2630_v5, %v3789_v35  ;;  %v3826_v0 = vunpack.c.l.bf16 %v2471_v4 }
 0x1f7   : > { %2464 = vmatprep.mubr.f32.mxu1 %v3947_v9 }
 0x1f8   : > { %v2645_v54 = vcombine.low %v2637_v6, %v2644_v31  ;;  %v2476_v8 = vcombine.high %v3826_v0, %v3826_v0 }
 0x1fa   : > { %v2652_v55 = vrot.slane %v2645_v54, %v3789_v35 }
 0x1fc   : > { %v2654_v13 = vadd.f32 %v2652_v55, %v2624_v56  ;;  %v2477_v56 = vcombine.high %v3828_v48, %v3828_v48 }
 0x1fe   : > { %2655 = vst.msk [vmem:[%s3286_s2] sm:$0xf] %vm3813_vm8, %v2654_v13 }
 0x2bb   : > { %v2151_v17 = vpop.f32.mrb[4].mxu0 }
 0x2bc   : > { %v2153_v29 = vpop.f32.mrb[5].mxu0  ;;  %v2303_v49 = vadd.f32 %v2286_v21, %v2151_v17 }
 0x2bd   : > { %v2240_v14 = vpop.f32.mrb[4].mxu1  ;;  %v2304_v24 = vadd.f32 %v2286_v21, %v2153_v29 }
 0x2be   : > { %v2242_v16 = vpop.f32.mrb[5].mxu1  ;;  %v2305_v26 = vadd.f32 %v2286_v21, %v2240_v14 }
 0x2bf   : > { %v2157_v9 = vpop.f32.mrb[6].mxu0  ;;  %v2306_v39 = vadd.f32 %v2286_v21, %v2242_v16 }
 0x2c0   : > { %v2307_v22 = vadd.f32 %v2291_v20, %v2157_v9  ;;  %v2159_v7 = vpop.f32.mrb[7].mxu0 }
 0x2c1   : > { %v2246_v27 = vpop.f32.mrb[6].mxu1  ;;  %v2308_v15 = vadd.f32 %v2291_v20, %v2159_v7 }
 0x2c2   : > { %v2953_v34 = vpack.c.bf16 %v2307_v22, %v2303_v49  ;;  %v2309_v36 = vadd.f32 %v2291_v20, %v2246_v27  ;;  %v2248_v57 = vpop.f32.mrb[7].mxu1 }
 0x2c3   : > { %v2951_v19 = vpack.c.bf16 %v2308_v15, %v2304_v24  ;;  %v2310_v40 = vadd.f32 %v2291_v20, %v2248_v57  ;;  %v2163_v58 = vpop.f32.mrb[8].mxu0 }
 0x2c4   : > { %v2961_v41 = vpack.c.bf16 %v2309_v36, %v2305_v26  ;;  %v2165_v18 = vpop.f32.mrb[9].mxu0  ;;  %v2311_v47 = vadd.f32 %v2296_v59, %v2163_v58 }
 0x2c5   : > { %v2959_v46 = vpack.c.bf16 %v2310_v40, %v2306_v39  ;;  %v2252_v32 = vpop.f32.mrb[8].mxu1  ;;  %2952 = vmatprep.subr.bf16.mxu0 %v2951_v19  ;;  %v2312_v11 = vadd.f32 %v2296_v59, %v2165_v18 }
 0x2c6   : > { %v2254_v50 = vpop.f32.mrb[9].mxu1  ;;  %2954 = vmatpush1.bf16.msra.mxu0 %v2953_v34  ;;  %v2313_v25 = vadd.f32 %v2296_v59, %v2252_v32 }
 0x2c7   : > { %2960 = vmatprep.subr.bf16.mxu1 %v2959_v46  ;;  %v2169_v28 = vpop.f32.mrb[10].mxu0  ;;  %v2314_v63 = vadd.f32 %v2296_v59, %v2254_v50 }
 0x2c8   : > { %2962 = vmatpush1.bf16.msra.mxu1 %v2961_v41  ;;  %v2315_v3 = vadd.f32 %v2301_v42, %v2169_v28  ;;  %v2171_v10 = vpop.f32.mrb[11].mxu0 }
 0x2c9   : > { %v2258_v44 = vpop.f32.mrb[10].mxu1  ;;  %v2316_v52 = vadd.f32 %v2301_v42, %v2171_v10 }
 0x2ca   : > { %v2957_v23 = vpack.c.bf16 %v2315_v3, %v2311_v47  ;;  %v2317_v2 = vadd.f32 %v2301_v42, %v2258_v44  ;;  %v2260_v62 = vpop.f32.mrb[11].mxu1 }
 0x2cb   : > { %v2955_v30 = vpack.c.bf16 %v2316_v52, %v2312_v11  ;;  %v2318_v53 = vadd.f32 %v2301_v42, %v2260_v62 }
 0x2cc   : > { %v2965_v45 = vpack.c.bf16 %v2317_v2, %v2313_v25 }
 0x2cd   : > { %v2963_v37 = vpack.c.bf16 %v2318_v53, %v2314_v63  ;;  %2956 = vmatprep.subr.bf16.mxu0 %v2955_v30 }
 0x2ce   : > { %2958 = vmatpush1.bf16.msra.mxu0 %v2957_v23 }
 0x2cf   : > { %2964 = vmatprep.subr.bf16.mxu1 %v2963_v37 }
 0x2d0   : > { %2966 = vmatpush1.bf16.msra.mxu1 %v2965_v45 }
 0x2d1   : > { %2897 = vmatmul.mubr.msk.f32.vlgmr.msra.gmra.mrb[12].mxu0 %vm1473_vm2, %v2319_v38 }
 0x2d3   : > { %2898 = vmatmul.mubr.msk.f32.vlgmr.msra.gmra.mrb[12].mxu1 %vm1473_vm2, %v2319_v38 }
 0x3a4   : > { %v2395_v33 = vpop.f32.mrb[12].mxu0 }
 0x3a5   : > { %v3832_v6 = vadd.f32 %v2395_v33, %v2324_v1  ;;  %v2397_v5 = vpop.f32.mrb[13].mxu0 }
 0x3a6   : > { %v2466_v31 = vpop.f32.mrb[12].mxu1  ;;  %v3834_v54 = vadd.f32 %v2397_v5, %v2324_v1 }
 0x3a7   : > { %v2480_v55 = vsub.f32 %v3832_v6, %v3826_v0  ;;  %v2467_v13 = vadd.f32 %v2466_v31, %v2324_v1  ;;  %v2468_v17 = vpop.f32.mrb[13].mxu1 }
 0x3a8   : > { %v2481_v29 = vsub.f32 %v3834_v54, %v2476_v8  ;;  %v2469_v14 = vadd.f32 %v2468_v17, %v2324_v1 }
 0x3a9   : > { %v2484_v20 = vmul.f32 %v2480_v55, %v2480_v55  ;;  %v2482_v16 = vsub.f32 %v2467_v13, %v3828_v48 }
 0x3aa   : > { %v2485_v21 = vmul.f32 %v2481_v29, %v2481_v29  ;;  %v2483_v9 = vsub.f32 %v2469_v14, %v2477_v56 }
 0x3ab   : > { %v2489_v49 = vsel %vm2488_vm9, %v2484_v20, 0.0  ;;  %v2486_v22 = vmul.f32 %v2482_v16, %v2482_v16 }
 0x3ac   : > { %v2490_v7 = vrot.slane %v2489_v49, 4  ;;  %v2496_v24 = vsel %vm2488_vm9, %v2485_v21, 0.0  ;;  %v2487_v27 = vmul.f32 %v2483_v9, %v2483_v9 }
 0x3ad   : > { %v2503_v15 = vsel %vm2488_vm9, %v2486_v22, 0.0  ;;  %v2497_v26 = vrot.slane %v2496_v24, 4 }
 0x3ae   : > { %v2491_v34 = vadd.f32 %v2490_v7, %v2489_v49  ;;  %v2504_v36 = vrot.slane %v2503_v15, 4  ;;  %v2510_v57 = vsel %vm2488_vm9, %v2487_v27, 0.0 }
 0x3af   : > { %v2498_v39 = vadd.f32 %v2497_v26, %v2496_v24  ;;  %v2511_v19 = vrot.slane %v2510_v57, 4 }
 0x3b0   : > { %v2492_v40 = vrot.slane %v2491_v34, 2  ;;  %v2505_v58 = vadd.f32 %v2504_v36, %v2503_v15 }
 0x3b1   : > { %v2499_v41 = vrot.slane %v2498_v39, 2  ;;  %v2512_v18 = vadd.f32 %v2511_v19, %v2510_v57 }
 0x3b2   : > { %v2493_v46 = vadd.f32 %v2492_v40, %v2491_v34  ;;  %v2506_v32 = vrot.slane %v2505_v58, 2 }
 0x3b3   : > { %v2500_v42 = vadd.f32 %v2499_v41, %v2498_v39  ;;  %v2513_v50 = vrot.slane %v2512_v18, 2 }
 0x3b4   : > { %v2494_v59 = vrot.slane %v2493_v46, 1  ;;  %v2507_v28 = vadd.f32 %v2506_v32, %v2505_v58 }
 0x3b5   : > { %v2501_v47 = vrot.slane %v2500_v42, 1  ;;  %v2514_v3 = vadd.f32 %v2513_v50, %v2512_v18 }
 0x3b6   : > { %v2495_v10 = vadd.f32 %v2494_v59, %v2493_v46  ;;  %v2508_v11 = vrot.slane %v2507_v28, 1 }
 0x3b7   : > { %v2502_v44 = vadd.f32 %v2501_v47, %v2500_v42  ;;  %v2515_v52 = vrot.slane %v2514_v3, 1 }
 0x3b8   : > { %v2580_v25 = vsel %vm2576_vm4, %v2495_v10, 0.0  ;;  %v2509_v23 = vadd.f32 %v2508_v11, %v2507_v28 }
 0x3b9   : > { %v2581_v2 = vsel %vm2577_vm6, %v2502_v44, 0.0  ;;  %v2516_v62 = vadd.f32 %v2515_v52, %v2514_v3 }
 0x3ba   : > { %v2582_v63 = vsel %vm2578_vm5, %v2509_v23, 0.0  ;;  %v2593_v30 = vcombine.low %v2580_v25, %v2581_v2 }
 0x3bb   : > { %v2583_v53 = vsel %vm2579_vm7, %v2516_v62, 0.0 }
 0x3bc   : > { %v2601_v45 = vrot.slane %v2593_v30, %v3789_v35  ;;  %v2594_v37 = vcombine.low %v2582_v63, %v2583_v53 }
 0x3be   : > { %v2608_v38 = vrot.slane %v2594_v37, %v3789_v35 }
 0x3c0   : > { %v2609_v4 = vcombine.low %v2601_v45, %v2608_v38  ;;  %2659 = sbr.rel (%p2900_p9) target bundleno = 967 (0x3c7), region = 100 }
 0x3c2   : > { %v2616_v1 = vrot.slane %v2609_v4, %v3789_v35 }
 0x3c4   : > { %v2618_v33 = vadd.f32 %v2616_v1, %v2588_v43  ;;  %2660 = vst.msk [vmem:[%s3291_s10] sm:$0xf] (!%p2900_p9), %vm3813_vm8, %v2616_v1 }
 0x3c6   : > { %2623 = vst.msk [vmem:[%s3278_s22] sm:$0xf] %vm3813_vm8, %v2618_v33 }
 0x3c7 PF: > { %v2665_v12 = vcombine.low %v3832_v6, %v3834_v54  ;;  %v2666_v51 = vcombine.low %v2467_v13, %v2469_v14  ;;  %2671 = vst [vmem:[#allocation3] sm:$0x77] %v3826_v0  ;;  %2672 = vst [vmem:[#allocation3 + $0x8] sm:$0x77] %v3828_v48 }
 0x3c9   : > { %2669 = vst [vmem:[#allocation2] sm:$0x77] %v2665_v12  ;;  %2670 = vst [vmem:[#allocation2 + $0x8] sm:$0x77] %v2666_v51 }
 0x3ca PF: > { %s3959_s17 = sld [smem:[#allocation8_spill]]  ;;  %s3960_s24 = sld [smem:[#allocation6_spill]] }
 0x3cb   : > { %s3961_s2 = sld [smem:[#allocation7_spill]]  ;;  %s3962_s25 = sld [smem:[#allocation9_spill]] }
 0x3cc   : > { %s3963_s3 = sld [smem:[#allocation10_spill]] }
 0x3d0   : > { %s32_s26 = sadd.s32 1, %s3959_s17  }
 0x3d1   : > { %p29_p10 = scmp.ge.s32.totalorder %s32_s26, 12  }
 0x3d3   :  { %31 = sbr.rel (!%p29_p10) target bundleno = 16 (0x10), region = 163 }

</bundles_post_ra>
